<compile_context>
chip_gen: v5e
topology: v5e:2x2
jax: 0.10.0
libtpu: 0.0.40
codegen_flags: <defaults>
</compile_context>

<pallas_src>
import jax
import jax.numpy as jnp
from jax import lax
from jax.experimental import pallas as pl
from jax.experimental.pallas import tpu as pltpu

LIPSWISH_SCALE = 0.909
ROW_ALIGN = 32  # row alignment of packed weight blocks (safe for f32 and bf16)


def _lipswish(x):
    return LIPSWISH_SCALE * x * jax.nn.sigmoid(x)   # 0.909 * silu(x)


def _round_up(x, m):
    return ((x + m - 1) // m) * m


def _block_diag(a, b):
    ra, ca = a.shape
    rb, cb = b.shape
    top = jnp.concatenate([a, jnp.zeros((ra, cb), a.dtype)], axis=1)
    bot = jnp.concatenate([jnp.zeros((rb, ca), b.dtype), b], axis=1)
    return jnp.concatenate([top, bot], axis=0)


# ----------------------------------------------------------------------------
# parameter init (matches nn.Linear default init) + packing into slabs
# ----------------------------------------------------------------------------
def _init_linear(key, fan_in, fan_out):
    kw, kb = jax.random.split(key)
    bound = 1.0 / (fan_in ** 0.5)
    w = jax.random.uniform(kw, (fan_in, fan_out), jnp.float32, -bound, bound)
    b = jax.random.uniform(kb, (1, fan_out), jnp.float32, -bound, bound)
    return w, b


def init_generator_params(key, data_size, initial_noise_size, noise_size,
                          hidden_size, mlp_size, num_layers):
    assert noise_size == 1, "diagonal noise + .squeeze(2) requires noise_size == 1"
    assert num_layers == 2, "kernel body is unrolled for num_layers == 2"
    ks = jax.random.split(key, 10)
    wi0, bi0 = _init_linear(ks[0], initial_noise_size, mlp_size)
    wi1, bi1 = _init_linear(ks[1], mlp_size, mlp_size)
    wi2, bi2 = _init_linear(ks[2], mlp_size, hidden_size)
    wd0, bd0 = _init_linear(ks[3], 1 + hidden_size, mlp_size)
    wd1, bd1 = _init_linear(ks[4], mlp_size, mlp_size)
    wd2, bd2 = _init_linear(ks[5], mlp_size, hidden_size)
    wg0, bg0 = _init_linear(ks[6], 1 + hidden_size, mlp_size)
    wg1, bg1 = _init_linear(ks[7], mlp_size, mlp_size)
    wg2, bg2 = _init_linear(ks[8], mlp_size, hidden_size * noise_size)
    wr, br = _init_linear(ks[9], hidden_size, data_size)
    return dict(wi0=wi0, bi0=bi0, wi1=wi1, bi1=bi1, wi2=wi2, bi2=bi2,
                wd0=wd0, bd0=bd0, wd1=wd1, bd1=bd1, wd2=wd2, bd2=bd2,
                wg0=wg0, bg0=bg0, wg1=wg1, bg1=bg1, wg2=wg2, bg2=bg2,
                wr=wr, br=br)


def pack_generator_params(params, mxu_dtype=jnp.bfloat16):
    """Pack all weights into one (rows, width) slab + one (8, width) bias slab."""
    f32 = jnp.float32
    g = lambda n: params[n].astype(f32)
    wi0, bi0, wi1, bi1, wi2, bi2 = g("wi0"), g("bi0"), g("wi1"), g("bi1"), g("wi2"), g("bi2")
    wd0, bd0, wd1, bd1, wd2, bd2 = g("wd0"), g("bd0"), g("wd1"), g("bd1"), g("wd2"), g("bd2")
    wg0, bg0, wg1, bg1, wg2, bg2 = g("wg0"), g("bg0"), g("wg1"), g("bg1"), g("wg2"), g("bg2")
    wr, br = g("wr"), g("br")

    In0, M = wi0.shape
    H = wi2.shape[1]
    D = wr.shape[1]
    In0p = _round_up(In0, 8)

    # fused drift|diffusion: shared layer-0 weights, block-diagonal layers 1/2
    wfx = jnp.concatenate([wd0[1:], wg0[1:]], axis=1)          # (H, 2M)
    wtf = jnp.concatenate([wd0[0:1], wg0[0:1]], axis=1)        # (1, 2M)  t-row
    b0f = jnp.concatenate([bd0, bg0], axis=1)                  # (1, 2M)
    w1f = _block_diag(wd1, wg1)                                # (2M, 2M)
    b1f = jnp.concatenate([bd1, bg1], axis=1)                  # (1, 2M)
    w2f = _block_diag(wd2, wg2)                                # (2M, 2H)
    b2f = jnp.concatenate([bd2, bg2], axis=1)                  # (1, 2H)
    # readout augmented with a leading zero column (slot for the ts column)
    wr_aug = jnp.concatenate([jnp.zeros((H, 1), f32), wr], axis=1)   # (H, 1+D)
    br_aug = jnp.concatenate([jnp.zeros((1, 1), f32), br], axis=1)   # (1, 1+D)

    width = max(2 * M, 2 * H, M, H, 1 + D)

    blocks = [
        ("wi0", jnp.zeros((In0p, M), f32).at[:In0].set(wi0)),
        ("wi1", wi1), ("wi2", wi2),
        ("wfx", wfx), ("w1f", w1f), ("w2f", w2f), ("wr", wr_aug),
    ]
    offs, placed, r = {}, [], 0
    for name, w in blocks:
        offs[name] = r
        placed.append((r, w))
        r += _round_up(w.shape[0], ROW_ALIGN)
    total_rows = _round_up(r, ROW_ALIGN)

    wslab = jnp.zeros((total_rows, width), f32)
    for r0, w in placed:
        wslab = wslab.at[r0:r0 + w.shape[0], 0:w.shape[1]].set(w)
    wslab = wslab.astype(mxu_dtype)     # bf16 MXU operands, halves DMA/VMEM

    bslab = jnp.zeros((8, width), f32)  # biases / t-row stay f32 (elementwise)
    for k, v in enumerate([bi0, bi1, bi2, wtf, b0f, b1f, b2f, br_aug]):
        bslab = bslab.at[k:k + 1, 0:v.shape[1]].set(v)

    dims = dict(In0=In0, In0p=In0p, M=M, H=H, D=D)
    return wslab, bslab, offs, dims


# ----------------------------------------------------------------------------
# kernel
# ----------------------------------------------------------------------------
def _make_kernel(*, T, B, H, M, D, In0p, offs, mxu_dtype):
    o_wi0, o_wi1, o_wi2 = offs["wi0"], offs["wi1"], offs["wi2"]
    o_wfx, o_w1f, o_w2f, o_wr = offs["wfx"], offs["w1f"], offs["w2f"], offs["wr"]
    W0 = 2 * M          # fused drift|diffusion hidden width
    W2 = 2 * H          # fused drift|diffusion output width
    DO = 1 + D          # output channels: [ts | data]

    def kernel(ts_ref, dw_ref, noise_ref, tcol_ref, w_ref, b_ref, out_ref, x_all):
        def mm(x, w):
            # bf16 (or f32) MXU operands, f32 accumulation
            return jnp.dot(x.astype(mxu_dtype), w,
                           preferred_element_type=jnp.float32)

        # ---- small constants hoisted out of the time loop (f32) -------------
        bi0 = b_ref[0:1, 0:M]
        bi1 = b_ref[1:2, 0:M]
        bi2 = b_ref[2:3, 0:H]
        wtf = b_ref[3:4, 0:W0]          # fused t-row of layer 0
        b0f = b_ref[4:5, 0:W0]
        b1f = b_ref[5:6, 0:W0]
        b2f = b_ref[6:7, 0:W2]
        br  = b_ref[7:8, 0:DO]

        def f_and_g(t, x):
            # fused drift+diffusion MLP on [t, x]; the t column of layer 0 is a
            # separate rank-1 term, layers 1/2 are block-diagonal.
            h = mm(x, w_ref[o_wfx:o_wfx + H, 0:W0]) + t * wtf + b0f
            h = _lipswish(h)
            h = mm(h, w_ref[o_w1f:o_w1f + W0, 0:W0]) + b1f
            h = _lipswish(h)
            o = jnp.tanh(mm(h, w_ref[o_w2f:o_w2f + W0, 0:W2]) + b2f)
            return o[:, 0:H], o[:, H:W2]   # drift, diffusion (noise_size == 1)

        # ---- x0 = initial MLP(init_noise)  (tanh=False) ----------------------
        h = _lipswish(mm(noise_ref[...], w_ref[o_wi0:o_wi0 + In0p, 0:M]) + bi0)
        h = _lipswish(mm(h, w_ref[o_wi1:o_wi1 + M, 0:M]) + bi1)
        y0 = mm(h, w_ref[o_wi2:o_wi2 + M, 0:H]) + bi2        # (B, H) f32
        x_all[0:B, :] = y0

        t0 = ts_ref[0]
        f0, g0 = f_and_g(t0, y0)

        # ---- reversible Heun (Stratonovich, diagonal noise) over resident dW -
        def step(i, carry):
            y_p, z_p, f_p, g_p = carry
            t_c = ts_ref[i]
            dt = t_c - ts_ref[i - 1]
            dw = dw_ref[i - 1]                                # (B, H) f32
            z_c = 2.0 * y_p - z_p + f_p * dt + g_p * dw
            f_c, g_c = f_and_g(t_c, z_c)
            y_c = y_p + (f_p + f_c) * (0.5 * dt) + (g_p + g_c) * (0.5 * dw)
            row = pl.multiple_of(i * B, B)
            x_all[pl.ds(row, B), :] = y_c
            return (y_c, z_c, f_c, g_c)

        lax.fori_loop(1, T, step, (y0, y0, f0, g0), unroll=(T <= 64))

        # ---- batched readout over all T*B states, ts column folded in --------
        # wr slab column 0 is zero and tcol carries ts in column 0 only.
        ys = mm(x_all[...], w_ref[o_wr:o_wr + H, 0:DO]) + br
        out_ref[...] = ys + tcol_ref[...]

    return kernel


# ----------------------------------------------------------------------------
# wrapper
# ----------------------------------------------------------------------------
def generator_forward(params, ts, init_noise, dw, *,
                      mxu_dtype=jnp.bfloat16, interpret=False):
    """ts: (T,) time grid; init_noise: (B, initial_noise_size);
    dw: (T-1, B, hidden) Brownian increments."""
    T = int(ts.shape[0])
    Tm1, B, H = dw.shape
    assert Tm1 == T - 1 and T >= 2

    wslab, bslab, offs, dims = pack_generator_params(params, mxu_dtype)
    assert dims["H"] == H
    In0, In0p, M, D = dims["In0"], dims["In0p"], dims["M"], dims["D"]

    ts_f = ts.astype(jnp.float32)
    noise_pad = jnp.zeros((B, In0p), jnp.float32).at[:, :In0].set(
        init_noise.astype(jnp.float32))
    # ts column of the fused output (column 0 = ts, other columns zero)
    tcol = jnp.zeros((T * B, 1 + D), jnp.float32).at[:, 0].set(jnp.repeat(ts_f, B))

    kernel = _make_kernel(T=T, B=B, H=H, M=M, D=D, In0p=In0p, offs=offs,
                          mxu_dtype=mxu_dtype)

    # Single kernel invocation: dW, packed weights and the output all resident
    # in VMEM (<100 KiB total); time loop runs inside the kernel.
    # NOTE: on v7x a further win would be a leading "parallel" batch-tile grid
    # axis to use the second TensorCore once B is large enough to split.
    out_flat = pl.pallas_call(
        kernel,
        out_shape=jax.ShapeDtypeStruct((T * B, 1 + D), jnp.float32),
        in_specs=[
            pl.BlockSpec(memory_space=pltpu.MemorySpace.SMEM),   # ts (scalars)
            pl.BlockSpec(memory_space=pltpu.MemorySpace.VMEM),   # dW, resident
            pl.BlockSpec(memory_space=pltpu.MemorySpace.VMEM),   # init noise
            pl.BlockSpec(memory_space=pltpu.MemorySpace.VMEM),   # ts column
            pl.BlockSpec(memory_space=pltpu.MemorySpace.VMEM),   # packed weights
            pl.BlockSpec(memory_space=pltpu.MemorySpace.VMEM),   # packed biases
        ],
        out_specs=pl.BlockSpec(memory_space=pltpu.MemorySpace.VMEM),
        scratch_shapes=[pltpu.VMEM((T * B, H), jnp.float32)],    # hidden states
        interpret=interpret,
    )(ts_f, dw.astype(jnp.float32), noise_pad, tcol, wslab, bslab)

    # (T*B, 1+D) -> (B, T, 1+D): reshape is free, transpose touches ~T*B*(1+D)
    # floats once.
    out = jnp.transpose(out_flat.reshape(T, B, 1 + D), (1, 0, 2))
    # TODO(synk): torchcde.linear_interpolation_coeffs is the identity for a
    # NaN-free series (no missing data), so it is a passthrough here.
    return out


if __name__ == "__main__":
    key = jax.random.PRNGKey(0)

    data_size = 3
    initial_noise_size = 5
    noise_size = 1
    hidden_size = 16
    mlp_size = 32
    num_layers = 2
    batch_size = 8
    t_size = 8

    k_par, k_noise, k_bm = jax.random.split(key, 3)
    params = init_generator_params(k_par, data_size, initial_noise_size,
                                   noise_size, hidden_size, mlp_size, num_layers)

    ts = jnp.arange(t_size, dtype=jnp.float32)                  # dt = 1.0 grid
    init_noise = jax.random.normal(
        k_noise, (batch_size, initial_noise_size), jnp.float32)
    dts = (ts[1:] - ts[:-1])[:, None, None]
    dw = jnp.sqrt(dts) * jax.random.normal(
        k_bm, (t_size - 1, batch_size, hidden_size), jnp.float32)

    out = generator_forward(params, ts, init_noise, dw)
    out = jax.block_until_ready(out)

    assert out.shape == (batch_size, t_size, 1 + data_size), out.shape
    assert bool(jnp.all(jnp.isfinite(out)))
    print("KERNEL_OK")
</pallas_src>

<mosaic_0001>
module attributes {stable_mosaic.version = 11 : i64} {
  func.func @kernel(%arg0: memref<8xf32, #tpu.memory_space<smem>>, %arg1: memref<7x8x16xf32, #tpu.memory_space<vmem>>, %arg2: memref<8x8xf32, #tpu.memory_space<vmem>>, %arg3: memref<64x4xf32, #tpu.memory_space<vmem>>, %arg4: memref<288x64xbf16, #tpu.memory_space<vmem>>, %arg5: memref<8x64xf32, #tpu.memory_space<vmem>>, %arg6: memref<64x4xf32, #tpu.memory_space<vmem>>, %arg7: memref<64x16xf32, #tpu.memory_space<vmem>>) attributes {dimension_semantics = [], scalar_prefetch = 0 : i64, scratch_operands = 1 : i64, tpu.core_type = #tpu.core_type<tc>} {
    %c0 = arith.constant 0 : index
    %c0_0 = arith.constant 0 : index
    %0 = vector.load %arg5[%c0, %c0_0] : memref<8x64xf32, #tpu.memory_space<vmem>>, vector<1x32xf32>
    %c1 = arith.constant 1 : index
    %c0_1 = arith.constant 0 : index
    %1 = vector.load %arg5[%c1, %c0_1] : memref<8x64xf32, #tpu.memory_space<vmem>>, vector<1x32xf32>
    %c2 = arith.constant 2 : index
    %c0_2 = arith.constant 0 : index
    %2 = vector.load %arg5[%c2, %c0_2] : memref<8x64xf32, #tpu.memory_space<vmem>>, vector<1x16xf32>
    %c3 = arith.constant 3 : index
    %c0_3 = arith.constant 0 : index
    %3 = vector.load %arg5[%c3, %c0_3] : memref<8x64xf32, #tpu.memory_space<vmem>>, vector<1x64xf32>
    %c4 = arith.constant 4 : index
    %c0_4 = arith.constant 0 : index
    %4 = vector.load %arg5[%c4, %c0_4] : memref<8x64xf32, #tpu.memory_space<vmem>>, vector<1x64xf32>
    %c5 = arith.constant 5 : index
    %c0_5 = arith.constant 0 : index
    %5 = vector.load %arg5[%c5, %c0_5] : memref<8x64xf32, #tpu.memory_space<vmem>>, vector<1x64xf32>
    %c6 = arith.constant 6 : index
    %c0_6 = arith.constant 0 : index
    %6 = vector.load %arg5[%c6, %c0_6] : memref<8x64xf32, #tpu.memory_space<vmem>>, vector<1x32xf32>
    %c7 = arith.constant 7 : index
    %c0_7 = arith.constant 0 : index
    %7 = vector.load %arg5[%c7, %c0_7] : memref<8x64xf32, #tpu.memory_space<vmem>>, vector<1x4xf32>
    %c0_8 = arith.constant 0 : index
    %c0_9 = arith.constant 0 : index
    %8 = vector.load %arg2[%c0_8, %c0_9] : memref<8x8xf32, #tpu.memory_space<vmem>>, vector<8x8xf32>
    %c0_10 = arith.constant 0 : index
    %c0_11 = arith.constant 0 : index
    %9 = vector.load %arg4[%c0_10, %c0_11] : memref<288x64xbf16, #tpu.memory_space<vmem>>, vector<8x32xbf16>
    %10 = arith.truncf %8 : vector<8x8xf32> to vector<8x8xbf16>
    %cst = arith.constant dense<0.000000e+00> : vector<8x32xf32>
    %11 = tpu.matmul %10, %9, %cst {dimension_numbers = #tpu.dot_dimension_numbers<[1], [0], [0], [1], [0, 0, 1, 1], [], []>} : vector<8x8xbf16>, vector<8x32xbf16>, vector<8x32xf32> -> vector<8x32xf32>
    %12 = vector.broadcast %0 : vector<1x32xf32> to vector<8x32xf32>
    %13 = arith.addf %11, %12 : vector<8x32xf32>
    %cst_12 = arith.constant 0.908999979 : f32
    %14 = vector.broadcast %cst_12 : f32 to vector<8x32xf32>
    %15 = arith.mulf %14, %13 : vector<8x32xf32>
    %16 = arith.negf %13 : vector<8x32xf32>
    %17 = math.exp %16 : vector<8x32xf32>
    %cst_13 = arith.constant 1.000000e+00 : f32
    %18 = vector.broadcast %cst_13 : f32 to vector<8x32xf32>
    %19 = arith.addf %18, %17 : vector<8x32xf32>
    %20 = arith.divf %18, %19 : vector<8x32xf32>
    %21 = arith.mulf %15, %20 : vector<8x32xf32>
    %c32 = arith.constant 32 : index
    %c0_14 = arith.constant 0 : index
    %22 = vector.load %arg4[%c32, %c0_14] : memref<288x64xbf16, #tpu.memory_space<vmem>>, vector<32x32xbf16>
    %23 = arith.truncf %21 : vector<8x32xf32> to vector<8x32xbf16>
    %cst_15 = arith.constant dense<0.000000e+00> : vector<8x32xf32>
    %24 = tpu.matmul %23, %22, %cst_15 {dimension_numbers = #tpu.dot_dimension_numbers<[1], [0], [0], [1], [0, 0, 1, 1], [], []>} : vector<8x32xbf16>, vector<32x32xbf16>, vector<8x32xf32> -> vector<8x32xf32>
    %25 = vector.broadcast %1 : vector<1x32xf32> to vector<8x32xf32>
    %26 = arith.addf %24, %25 : vector<8x32xf32>
    %cst_16 = arith.constant 0.908999979 : f32
    %27 = vector.broadcast %cst_16 : f32 to vector<8x32xf32>
    %28 = arith.mulf %27, %26 : vector<8x32xf32>
    %29 = arith.negf %26 : vector<8x32xf32>
    %30 = math.exp %29 : vector<8x32xf32>
    %cst_17 = arith.constant 1.000000e+00 : f32
    %31 = vector.broadcast %cst_17 : f32 to vector<8x32xf32>
    %32 = arith.addf %31, %30 : vector<8x32xf32>
    %33 = arith.divf %31, %32 : vector<8x32xf32>
    %34 = arith.mulf %28, %33 : vector<8x32xf32>
    %c64 = arith.constant 64 : index
    %c0_18 = arith.constant 0 : index
    %35 = vector.load %arg4[%c64, %c0_18] : memref<288x64xbf16, #tpu.memory_space<vmem>>, vector<32x16xbf16>
    %36 = arith.truncf %34 : vector<8x32xf32> to vector<8x32xbf16>
    %cst_19 = arith.constant dense<0.000000e+00> : vector<8x16xf32>
    %37 = tpu.matmul %36, %35, %cst_19 {dimension_numbers = #tpu.dot_dimension_numbers<[1], [0], [0], [1], [0, 0, 1, 1], [], []>} : vector<8x32xbf16>, vector<32x16xbf16>, vector<8x16xf32> -> vector<8x16xf32>
    %38 = vector.broadcast %2 : vector<1x16xf32> to vector<8x16xf32>
    %39 = arith.addf %37, %38 : vector<8x16xf32>
    %c0_20 = arith.constant 0 : index
    %c0_21 = arith.constant 0 : index
    %40 = vector.load %arg7[%c0_20, %c0_21] : memref<64x16xf32, #tpu.memory_space<vmem>>, vector<8x16xf32>
    tpu.vector_store %arg7[%c0_20, %c0_21], %39 {strides = array<i32>} : memref<64x16xf32, #tpu.memory_space<vmem>>, vector<8x16xf32>,
    %c0_22 = arith.constant 0 : index
    %41 = memref.load %arg0[%c0_22] : memref<8xf32, #tpu.memory_space<smem>>
    %c96 = arith.constant 96 : index
    %c0_23 = arith.constant 0 : index
    %42 = vector.load %arg4[%c96, %c0_23] : memref<288x64xbf16, #tpu.memory_space<vmem>>, vector<16x64xbf16>
    %43 = arith.truncf %39 : vector<8x16xf32> to vector<8x16xbf16>
    %cst_24 = arith.constant dense<0.000000e+00> : vector<8x64xf32>
    %44 = tpu.matmul %43, %42, %cst_24 {dimension_numbers = #tpu.dot_dimension_numbers<[1], [0], [0], [1], [0, 0, 1, 1], [], []>} : vector<8x16xbf16>, vector<16x64xbf16>, vector<8x64xf32> -> vector<8x64xf32>
    %45 = vector.broadcast %41 : f32 to vector<1x64xf32>
    %46 = arith.mulf %45, %3 : vector<1x64xf32>
    %47 = vector.broadcast %46 : vector<1x64xf32> to vector<8x64xf32>
    %48 = arith.addf %44, %47 : vector<8x64xf32>
    %49 = vector.broadcast %4 : vector<1x64xf32> to vector<8x64xf32>
    %50 = arith.addf %48, %49 : vector<8x64xf32>
    %cst_25 = arith.constant 0.908999979 : f32
    %51 = vector.broadcast %cst_25 : f32 to vector<8x64xf32>
    %52 = arith.mulf %51, %50 : vector<8x64xf32>
    %53 = arith.negf %50 : vector<8x64xf32>
    %54 = math.exp %53 : vector<8x64xf32>
    %cst_26 = arith.constant 1.000000e+00 : f32
    %55 = vector.broadcast %cst_26 : f32 to vector<8x64xf32>
    %56 = arith.addf %55, %54 : vector<8x64xf32>
    %57 = arith.divf %55, %56 : vector<8x64xf32>
    %58 = arith.mulf %52, %57 : vector<8x64xf32>
    %c128 = arith.constant 128 : index
    %c0_27 = arith.constant 0 : index
    %59 = vector.load %arg4[%c128, %c0_27] : memref<288x64xbf16, #tpu.memory_space<vmem>>, vector<64x64xbf16>
    %60 = arith.truncf %58 : vector<8x64xf32> to vector<8x64xbf16>
    %cst_28 = arith.constant dense<0.000000e+00> : vector<8x64xf32>
    %61 = tpu.matmul %60, %59, %cst_28 {dimension_numbers = #tpu.dot_dimension_numbers<[1], [0], [0], [1], [0, 0, 1, 1], [], []>} : vector<8x64xbf16>, vector<64x64xbf16>, vector<8x64xf32> -> vector<8x64xf32>
    %62 = vector.broadcast %5 : vector<1x64xf32> to vector<8x64xf32>
    %63 = arith.addf %61, %62 : vector<8x64xf32>
    %cst_29 = arith.constant 0.908999979 : f32
    %64 = vector.broadcast %cst_29 : f32 to vector<8x64xf32>
    %65 = arith.mulf %64, %63 : vector<8x64xf32>
    %66 = arith.negf %63 : vector<8x64xf32>
    %67 = math.exp %66 : vector<8x64xf32>
    %cst_30 = arith.constant 1.000000e+00 : f32
    %68 = vector.broadcast %cst_30 : f32 to vector<8x64xf32>
    %69 = arith.addf %68, %67 : vector<8x64xf32>
    %70 = arith.divf %68, %69 : vector<8x64xf32>
    %71 = arith.mulf %65, %70 : vector<8x64xf32>
    %c192 = arith.constant 192 : index
    %c0_31 = arith.constant 0 : index
    %72 = vector.load %arg4[%c192, %c0_31] : memref<288x64xbf16, #tpu.memory_space<vmem>>, vector<64x32xbf16>
    %73 = arith.truncf %71 : vector<8x64xf32> to vector<8x64xbf16>
    %cst_32 = arith.constant dense<0.000000e+00> : vector<8x32xf32>
    %74 = tpu.matmul %73, %72, %cst_32 {dimension_numbers = #tpu.dot_dimension_numbers<[1], [0], [0], [1], [0, 0, 1, 1], [], []>} : vector<8x64xbf16>, vector<64x32xbf16>, vector<8x32xf32> -> vector<8x32xf32>
    %75 = vector.broadcast %6 : vector<1x32xf32> to vector<8x32xf32>
    %76 = arith.addf %74, %75 : vector<8x32xf32>
    %77 = math.tanh %76 : vector<8x32xf32>
    %78 = vector.extract_strided_slice %77 {offsets = [0, 0], sizes = [8, 16], strides = [1, 1]} : vector<8x32xf32> to vector<8x16xf32>
    %79 = vector.extract_strided_slice %77 {offsets = [0, 16], sizes = [8, 16], strides = [1, 1]} : vector<8x32xf32> to vector<8x16xf32>
    %c1_i32 = arith.constant 1 : i32
    %80 = arith.index_cast %c1_i32 : i32 to index
    %81 = memref.load %arg0[%80] : memref<8xf32, #tpu.memory_space<smem>>
    %c1_i32_33 = arith.constant 1 : i32
    %82 = arith.subi %c1_i32, %c1_i32_33 : i32
    %83 = arith.index_cast %82 : i32 to index
    %84 = memref.load %arg0[%83] : memref<8xf32, #tpu.memory_space<smem>>
    %85 = arith.subf %81, %84 : f32
    %c1_i32_34 = arith.constant 1 : i32
    %86 = arith.subi %c1_i32, %c1_i32_34 : i32
    %87 = arith.index_cast %86 : i32 to index
    %c0_35 = arith.constant 0 : index
    %c0_36 = arith.constant 0 : index
    %88 = vector.load %arg1[%87, %c0_35, %c0_36] : memref<7x8x16xf32, #tpu.memory_space<vmem>>, vector<1x8x16xf32>
    %89 = vector.shape_cast %88 : vector<1x8x16xf32> to vector<8x16xf32>
    %cst_37 = arith.constant 2.000000e+00 : f32
    %90 = vector.broadcast %cst_37 : f32 to vector<8x16xf32>
    %91 = arith.mulf %90, %39 : vector<8x16xf32>
    %92 = arith.subf %91, %39 : vector<8x16xf32>
    %93 = vector.broadcast %85 : f32 to vector<8x16xf32>
    %94 = arith.mulf %78, %93 : vector<8x16xf32>
    %95 = arith.addf %92, %94 : vector<8x16xf32>
    %96 = arith.mulf %79, %89 : vector<8x16xf32>
    %97 = arith.addf %95, %96 : vector<8x16xf32>
    %c96_38 = arith.constant 96 : index
    %c0_39 = arith.constant 0 : index
    %98 = vector.load %arg4[%c96_38, %c0_39] : memref<288x64xbf16, #tpu.memory_space<vmem>>, vector<16x64xbf16>
    %99 = arith.truncf %97 : vector<8x16xf32> to vector<8x16xbf16>
    %cst_40 = arith.constant dense<0.000000e+00> : vector<8x64xf32>
    %100 = tpu.matmul %99, %98, %cst_40 {dimension_numbers = #tpu.dot_dimension_numbers<[1], [0], [0], [1], [0, 0, 1, 1], [], []>} : vector<8x16xbf16>, vector<16x64xbf16>, vector<8x64xf32> -> vector<8x64xf32>
    %101 = vector.broadcast %81 : f32 to vector<1x64xf32>
    %102 = arith.mulf %101, %3 : vector<1x64xf32>
    %103 = vector.broadcast %102 : vector<1x64xf32> to vector<8x64xf32>
    %104 = arith.addf %100, %103 : vector<8x64xf32>
    %105 = vector.broadcast %4 : vector<1x64xf32> to vector<8x64xf32>
    %106 = arith.addf %104, %105 : vector<8x64xf32>
    %cst_41 = arith.constant 0.908999979 : f32
    %107 = vector.broadcast %cst_41 : f32 to vector<8x64xf32>
    %108 = arith.mulf %107, %106 : vector<8x64xf32>
    %109 = arith.negf %106 : vector<8x64xf32>
    %110 = math.exp %109 : vector<8x64xf32>
    %cst_42 = arith.constant 1.000000e+00 : f32
    %111 = vector.broadcast %cst_42 : f32 to vector<8x64xf32>
    %112 = arith.addf %111, %110 : vector<8x64xf32>
    %113 = arith.divf %111, %112 : vector<8x64xf32>
    %114 = arith.mulf %108, %113 : vector<8x64xf32>
    %c128_43 = arith.constant 128 : index
    %c0_44 = arith.constant 0 : index
    %115 = vector.load %arg4[%c128_43, %c0_44] : memref<288x64xbf16, #tpu.memory_space<vmem>>, vector<64x64xbf16>
    %116 = arith.truncf %114 : vector<8x64xf32> to vector<8x64xbf16>
    %cst_45 = arith.constant dense<0.000000e+00> : vector<8x64xf32>
    %117 = tpu.matmul %116, %115, %cst_45 {dimension_numbers = #tpu.dot_dimension_numbers<[1], [0], [0], [1], [0, 0, 1, 1], [], []>} : vector<8x64xbf16>, vector<64x64xbf16>, vector<8x64xf32> -> vector<8x64xf32>
    %118 = vector.broadcast %5 : vector<1x64xf32> to vector<8x64xf32>
    %119 = arith.addf %117, %118 : vector<8x64xf32>
    %cst_46 = arith.constant 0.908999979 : f32
    %120 = vector.broadcast %cst_46 : f32 to vector<8x64xf32>
    %121 = arith.mulf %120, %119 : vector<8x64xf32>
    %122 = arith.negf %119 : vector<8x64xf32>
    %123 = math.exp %122 : vector<8x64xf32>
    %cst_47 = arith.constant 1.000000e+00 : f32
    %124 = vector.broadcast %cst_47 : f32 to vector<8x64xf32>
    %125 = arith.addf %124, %123 : vector<8x64xf32>
    %126 = arith.divf %124, %125 : vector<8x64xf32>
    %127 = arith.mulf %121, %126 : vector<8x64xf32>
    %c192_48 = arith.constant 192 : index
    %c0_49 = arith.constant 0 : index
    %128 = vector.load %arg4[%c192_48, %c0_49] : memref<288x64xbf16, #tpu.memory_space<vmem>>, vector<64x32xbf16>
    %129 = arith.truncf %127 : vector<8x64xf32> to vector<8x64xbf16>
    %cst_50 = arith.constant dense<0.000000e+00> : vector<8x32xf32>
    %130 = tpu.matmul %129, %128, %cst_50 {dimension_numbers = #tpu.dot_dimension_numbers<[1], [0], [0], [1], [0, 0, 1, 1], [], []>} : vector<8x64xbf16>, vector<64x32xbf16>, vector<8x32xf32> -> vector<8x32xf32>
    %131 = vector.broadcast %6 : vector<1x32xf32> to vector<8x32xf32>
    %132 = arith.addf %130, %131 : vector<8x32xf32>
    %133 = math.tanh %132 : vector<8x32xf32>
    %134 = vector.extract_strided_slice %133 {offsets = [0, 0], sizes = [8, 16], strides = [1, 1]} : vector<8x32xf32> to vector<8x16xf32>
    %135 = vector.extract_strided_slice %133 {offsets = [0, 16], sizes = [8, 16], strides = [1, 1]} : vector<8x32xf32> to vector<8x16xf32>
    %136 = arith.addf %78, %134 : vector<8x16xf32>
    %cst_51 = arith.constant 5.000000e-01 : f32
    %137 = arith.mulf %cst_51, %85 : f32
    %138 = vector.broadcast %137 : f32 to vector<8x16xf32>
    %139 = arith.mulf %136, %138 : vector<8x16xf32>
    %140 = arith.addf %39, %139 : vector<8x16xf32>
    %141 = arith.addf %79, %135 : vector<8x16xf32>
    %cst_52 = arith.constant 5.000000e-01 : f32
    %142 = vector.broadcast %cst_52 : f32 to vector<8x16xf32>
    %143 = arith.mulf %142, %89 : vector<8x16xf32>
    %144 = arith.mulf %141, %143 : vector<8x16xf32>
    %145 = arith.addf %140, %144 : vector<8x16xf32>
    %c8_i32 = arith.constant 8 : i32
    %146 = arith.muli %c1_i32, %c8_i32 : i32
    %147 = tpu.assume_multiple %146, 8 : i32
    %148 = arith.index_cast %147 : i32 to index
    %c0_53 = arith.constant 0 : index
    %149 = vector.load %arg7[%148, %c0_53] : memref<64x16xf32, #tpu.memory_space<vmem>>, vector<8x16xf32>
    tpu.vector_store %arg7[%148, %c0_53], %145 {strides = array<i32>} : memref<64x16xf32, #tpu.memory_space<vmem>>, vector<8x16xf32>,
    %c2_i32 = arith.constant 2 : i32
    %150 = arith.index_cast %c2_i32 : i32 to index
    %151 = memref.load %arg0[%150] : memref<8xf32, #tpu.memory_space<smem>>
    %c1_i32_54 = arith.constant 1 : i32
    %152 = arith.subi %c2_i32, %c1_i32_54 : i32
    %153 = arith.index_cast %152 : i32 to index
    %154 = memref.load %arg0[%153] : memref<8xf32, #tpu.memory_space<smem>>
    %155 = arith.subf %151, %154 : f32
    %c1_i32_55 = arith.constant 1 : i32
    %156 = arith.subi %c2_i32, %c1_i32_55 : i32
    %157 = arith.index_cast %156 : i32 to index
    %c0_56 = arith.constant 0 : index
    %c0_57 = arith.constant 0 : index
    %158 = vector.load %arg1[%157, %c0_56, %c0_57] : memref<7x8x16xf32, #tpu.memory_space<vmem>>, vector<1x8x16xf32>
    %159 = vector.shape_cast %158 : vector<1x8x16xf32> to vector<8x16xf32>
    %cst_58 = arith.constant 2.000000e+00 : f32
    %160 = vector.broadcast %cst_58 : f32 to vector<8x16xf32>
    %161 = arith.mulf %160, %145 : vector<8x16xf32>
    %162 = arith.subf %161, %97 : vector<8x16xf32>
    %163 = vector.broadcast %155 : f32 to vector<8x16xf32>
    %164 = arith.mulf %134, %163 : vector<8x16xf32>
    %165 = arith.addf %162, %164 : vector<8x16xf32>
    %166 = arith.mulf %135, %159 : vector<8x16xf32>
    %167 = arith.addf %165, %166 : vector<8x16xf32>
    %c96_59 = arith.constant 96 : index
    %c0_60 = arith.constant 0 : index
    %168 = vector.load %arg4[%c96_59, %c0_60] : memref<288x64xbf16, #tpu.memory_space<vmem>>, vector<16x64xbf16>
    %169 = arith.truncf %167 : vector<8x16xf32> to vector<8x16xbf16>
    %cst_61 = arith.constant dense<0.000000e+00> : vector<8x64xf32>
    %170 = tpu.matmul %169, %168, %cst_61 {dimension_numbers = #tpu.dot_dimension_numbers<[1], [0], [0], [1], [0, 0, 1, 1], [], []>} : vector<8x16xbf16>, vector<16x64xbf16>, vector<8x64xf32> -> vector<8x64xf32>
    %171 = vector.broadcast %151 : f32 to vector<1x64xf32>
    %172 = arith.mulf %171, %3 : vector<1x64xf32>
    %173 = vector.broadcast %172 : vector<1x64xf32> to vector<8x64xf32>
    %174 = arith.addf %170, %173 : vector<8x64xf32>
    %175 = vector.broadcast %4 : vector<1x64xf32> to vector<8x64xf32>
    %176 = arith.addf %174, %175 : vector<8x64xf32>
    %cst_62 = arith.constant 0.908999979 : f32
    %177 = vector.broadcast %cst_62 : f32 to vector<8x64xf32>
    %178 = arith.mulf %177, %176 : vector<8x64xf32>
    %179 = arith.negf %176 : vector<8x64xf32>
    %180 = math.exp %179 : vector<8x64xf32>
    %cst_63 = arith.constant 1.000000e+00 : f32
    %181 = vector.broadcast %cst_63 : f32 to vector<8x64xf32>
    %182 = arith.addf %181, %180 : vector<8x64xf32>
    %183 = arith.divf %181, %182 : vector<8x64xf32>
    %184 = arith.mulf %178, %183 : vector<8x64xf32>
    %c128_64 = arith.constant 128 : index
    %c0_65 = arith.constant 0 : index
    %185 = vector.load %arg4[%c128_64, %c0_65] : memref<288x64xbf16, #tpu.memory_space<vmem>>, vector<64x64xbf16>
    %186 = arith.truncf %184 : vector<8x64xf32> to vector<8x64xbf16>
    %cst_66 = arith.constant dense<0.000000e+00> : vector<8x64xf32>
    %187 = tpu.matmul %186, %185, %cst_66 {dimension_numbers = #tpu.dot_dimension_numbers<[1], [0], [0], [1], [0, 0, 1, 1], [], []>} : vector<8x64xbf16>, vector<64x64xbf16>, vector<8x64xf32> -> vector<8x64xf32>
    %188 = vector.broadcast %5 : vector<1x64xf32> to vector<8x64xf32>
    %189 = arith.addf %187, %188 : vector<8x64xf32>
    %cst_67 = arith.constant 0.908999979 : f32
    %190 = vector.broadcast %cst_67 : f32 to vector<8x64xf32>
    %191 = arith.mulf %190, %189 : vector<8x64xf32>
    %192 = arith.negf %189 : vector<8x64xf32>
    %193 = math.exp %192 : vector<8x64xf32>
    %cst_68 = arith.constant 1.000000e+00 : f32
    %194 = vector.broadcast %cst_68 : f32 to vector<8x64xf32>
    %195 = arith.addf %194, %193 : vector<8x64xf32>
    %196 = arith.divf %194, %195 : vector<8x64xf32>
    %197 = arith.mulf %191, %196 : vector<8x64xf32>
    %c192_69 = arith.constant 192 : index
    %c0_70 = arith.constant 0 : index
    %198 = vector.load %arg4[%c192_69, %c0_70] : memref<288x64xbf16, #tpu.memory_space<vmem>>, vector<64x32xbf16>
    %199 = arith.truncf %197 : vector<8x64xf32> to vector<8x64xbf16>
    %cst_71 = arith.constant dense<0.000000e+00> : vector<8x32xf32>
    %200 = tpu.matmul %199, %198, %cst_71 {dimension_numbers = #tpu.dot_dimension_numbers<[1], [0], [0], [1], [0, 0, 1, 1], [], []>} : vector<8x64xbf16>, vector<64x32xbf16>, vector<8x32xf32> -> vector<8x32xf32>
    %201 = vector.broadcast %6 : vector<1x32xf32> to vector<8x32xf32>
    %202 = arith.addf %200, %201 : vector<8x32xf32>
    %203 = math.tanh %202 : vector<8x32xf32>
    %204 = vector.extract_strided_slice %203 {offsets = [0, 0], sizes = [8, 16], strides = [1, 1]} : vector<8x32xf32> to vector<8x16xf32>
    %205 = vector.extract_strided_slice %203 {offsets = [0, 16], sizes = [8, 16], strides = [1, 1]} : vector<8x32xf32> to vector<8x16xf32>
    %206 = arith.addf %134, %204 : vector<8x16xf32>
    %cst_72 = arith.constant 5.000000e-01 : f32
    %207 = arith.mulf %cst_72, %155 : f32
    %208 = vector.broadcast %207 : f32 to vector<8x16xf32>
    %209 = arith.mulf %206, %208 : vector<8x16xf32>
    %210 = arith.addf %145, %209 : vector<8x16xf32>
    %211 = arith.addf %135, %205 : vector<8x16xf32>
    %cst_73 = arith.constant 5.000000e-01 : f32
    %212 = vector.broadcast %cst_73 : f32 to vector<8x16xf32>
    %213 = arith.mulf %212, %159 : vector<8x16xf32>
    %214 = arith.mulf %211, %213 : vector<8x16xf32>
    %215 = arith.addf %210, %214 : vector<8x16xf32>
    %c8_i32_74 = arith.constant 8 : i32
    %216 = arith.muli %c2_i32, %c8_i32_74 : i32
    %217 = tpu.assume_multiple %216, 8 : i32
    %218 = arith.index_cast %217 : i32 to index
    %c0_75 = arith.constant 0 : index
    %219 = vector.load %arg7[%218, %c0_75] : memref<64x16xf32, #tpu.memory_space<vmem>>, vector<8x16xf32>
    tpu.vector_store %arg7[%218, %c0_75], %215 {strides = array<i32>} : memref<64x16xf32, #tpu.memory_space<vmem>>, vector<8x16xf32>,
    %c3_i32 = arith.constant 3 : i32
    %220 = arith.index_cast %c3_i32 : i32 to index
    %221 = memref.load %arg0[%220] : memref<8xf32, #tpu.memory_space<smem>>
    %c1_i32_76 = arith.constant 1 : i32
    %222 = arith.subi %c3_i32, %c1_i32_76 : i32
    %223 = arith.index_cast %222 : i32 to index
    %224 = memref.load %arg0[%223] : memref<8xf32, #tpu.memory_space<smem>>
    %225 = arith.subf %221, %224 : f32
    %c1_i32_77 = arith.constant 1 : i32
    %226 = arith.subi %c3_i32, %c1_i32_77 : i32
    %227 = arith.index_cast %226 : i32 to index
    %c0_78 = arith.constant 0 : index
    %c0_79 = arith.constant 0 : index
    %228 = vector.load %arg1[%227, %c0_78, %c0_79] : memref<7x8x16xf32, #tpu.memory_space<vmem>>, vector<1x8x16xf32>
    %229 = vector.shape_cast %228 : vector<1x8x16xf32> to vector<8x16xf32>
    %cst_80 = arith.constant 2.000000e+00 : f32
    %230 = vector.broadcast %cst_80 : f32 to vector<8x16xf32>
    %231 = arith.mulf %230, %215 : vector<8x16xf32>
    %232 = arith.subf %231, %167 : vector<8x16xf32>
    %233 = vector.broadcast %225 : f32 to vector<8x16xf32>
    %234 = arith.mulf %204, %233 : vector<8x16xf32>
    %235 = arith.addf %232, %234 : vector<8x16xf32>
    %236 = arith.mulf %205, %229 : vector<8x16xf32>
    %237 = arith.addf %235, %236 : vector<8x16xf32>
    %c96_81 = arith.constant 96 : index
    %c0_82 = arith.constant 0 : index
    %238 = vector.load %arg4[%c96_81, %c0_82] : memref<288x64xbf16, #tpu.memory_space<vmem>>, vector<16x64xbf16>
    %239 = arith.truncf %237 : vector<8x16xf32> to vector<8x16xbf16>
    %cst_83 = arith.constant dense<0.000000e+00> : vector<8x64xf32>
    %240 = tpu.matmul %239, %238, %cst_83 {dimension_numbers = #tpu.dot_dimension_numbers<[1], [0], [0], [1], [0, 0, 1, 1], [], []>} : vector<8x16xbf16>, vector<16x64xbf16>, vector<8x64xf32> -> vector<8x64xf32>
    %241 = vector.broadcast %221 : f32 to vector<1x64xf32>
    %242 = arith.mulf %241, %3 : vector<1x64xf32>
    %243 = vector.broadcast %242 : vector<1x64xf32> to vector<8x64xf32>
    %244 = arith.addf %240, %243 : vector<8x64xf32>
    %245 = vector.broadcast %4 : vector<1x64xf32> to vector<8x64xf32>
    %246 = arith.addf %244, %245 : vector<8x64xf32>
    %cst_84 = arith.constant 0.908999979 : f32
    %247 = vector.broadcast %cst_84 : f32 to vector<8x64xf32>
    %248 = arith.mulf %247, %246 : vector<8x64xf32>
    %249 = arith.negf %246 : vector<8x64xf32>
    %250 = math.exp %249 : vector<8x64xf32>
    %cst_85 = arith.constant 1.000000e+00 : f32
    %251 = vector.broadcast %cst_85 : f32 to vector<8x64xf32>
    %252 = arith.addf %251, %250 : vector<8x64xf32>
    %253 = arith.divf %251, %252 : vector<8x64xf32>
    %254 = arith.mulf %248, %253 : vector<8x64xf32>
    %c128_86 = arith.constant 128 : index
    %c0_87 = arith.constant 0 : index
    %255 = vector.load %arg4[%c128_86, %c0_87] : memref<288x64xbf16, #tpu.memory_space<vmem>>, vector<64x64xbf16>
    %256 = arith.truncf %254 : vector<8x64xf32> to vector<8x64xbf16>
    %cst_88 = arith.constant dense<0.000000e+00> : vector<8x64xf32>
    %257 = tpu.matmul %256, %255, %cst_88 {dimension_numbers = #tpu.dot_dimension_numbers<[1], [0], [0], [1], [0, 0, 1, 1], [], []>} : vector<8x64xbf16>, vector<64x64xbf16>, vector<8x64xf32> -> vector<8x64xf32>
    %258 = vector.broadcast %5 : vector<1x64xf32> to vector<8x64xf32>
    %259 = arith.addf %257, %258 : vector<8x64xf32>
    %cst_89 = arith.constant 0.908999979 : f32
    %260 = vector.broadcast %cst_89 : f32 to vector<8x64xf32>
    %261 = arith.mulf %260, %259 : vector<8x64xf32>
    %262 = arith.negf %259 : vector<8x64xf32>
    %263 = math.exp %262 : vector<8x64xf32>
    %cst_90 = arith.constant 1.000000e+00 : f32
    %264 = vector.broadcast %cst_90 : f32 to vector<8x64xf32>
    %265 = arith.addf %264, %263 : vector<8x64xf32>
    %266 = arith.divf %264, %265 : vector<8x64xf32>
    %267 = arith.mulf %261, %266 : vector<8x64xf32>
    %c192_91 = arith.constant 192 : index
    %c0_92 = arith.constant 0 : index
    %268 = vector.load %arg4[%c192_91, %c0_92] : memref<288x64xbf16, #tpu.memory_space<vmem>>, vector<64x32xbf16>
    %269 = arith.truncf %267 : vector<8x64xf32> to vector<8x64xbf16>
    %cst_93 = arith.constant dense<0.000000e+00> : vector<8x32xf32>
    %270 = tpu.matmul %269, %268, %cst_93 {dimension_numbers = #tpu.dot_dimension_numbers<[1], [0], [0], [1], [0, 0, 1, 1], [], []>} : vector<8x64xbf16>, vector<64x32xbf16>, vector<8x32xf32> -> vector<8x32xf32>
    %271 = vector.broadcast %6 : vector<1x32xf32> to vector<8x32xf32>
    %272 = arith.addf %270, %271 : vector<8x32xf32>
    %273 = math.tanh %272 : vector<8x32xf32>
    %274 = vector.extract_strided_slice %273 {offsets = [0, 0], sizes = [8, 16], strides = [1, 1]} : vector<8x32xf32> to vector<8x16xf32>
    %275 = vector.extract_strided_slice %273 {offsets = [0, 16], sizes = [8, 16], strides = [1, 1]} : vector<8x32xf32> to vector<8x16xf32>
    %276 = arith.addf %204, %274 : vector<8x16xf32>
    %cst_94 = arith.constant 5.000000e-01 : f32
    %277 = arith.mulf %cst_94, %225 : f32
    %278 = vector.broadcast %277 : f32 to vector<8x16xf32>
    %279 = arith.mulf %276, %278 : vector<8x16xf32>
    %280 = arith.addf %215, %279 : vector<8x16xf32>
    %281 = arith.addf %205, %275 : vector<8x16xf32>
    %cst_95 = arith.constant 5.000000e-01 : f32
    %282 = vector.broadcast %cst_95 : f32 to vector<8x16xf32>
    %283 = arith.mulf %282, %229 : vector<8x16xf32>
    %284 = arith.mulf %281, %283 : vector<8x16xf32>
    %285 = arith.addf %280, %284 : vector<8x16xf32>
    %c8_i32_96 = arith.constant 8 : i32
    %286 = arith.muli %c3_i32, %c8_i32_96 : i32
    %287 = tpu.assume_multiple %286, 8 : i32
    %288 = arith.index_cast %287 : i32 to index
    %c0_97 = arith.constant 0 : index
    %289 = vector.load %arg7[%288, %c0_97] : memref<64x16xf32, #tpu.memory_space<vmem>>, vector<8x16xf32>
    tpu.vector_store %arg7[%288, %c0_97], %285 {strides = array<i32>} : memref<64x16xf32, #tpu.memory_space<vmem>>, vector<8x16xf32>,
    %c4_i32 = arith.constant 4 : i32
    %290 = arith.index_cast %c4_i32 : i32 to index
    %291 = memref.load %arg0[%290] : memref<8xf32, #tpu.memory_space<smem>>
    %c1_i32_98 = arith.constant 1 : i32
    %292 = arith.subi %c4_i32, %c1_i32_98 : i32
    %293 = arith.index_cast %292 : i32 to index
    %294 = memref.load %arg0[%293] : memref<8xf32, #tpu.memory_space<smem>>
    %295 = arith.subf %291, %294 : f32
    %c1_i32_99 = arith.constant 1 : i32
    %296 = arith.subi %c4_i32, %c1_i32_99 : i32
    %297 = arith.index_cast %296 : i32 to index
    %c0_100 = arith.constant 0 : index
    %c0_101 = arith.constant 0 : index
    %298 = vector.load %arg1[%297, %c0_100, %c0_101] : memref<7x8x16xf32, #tpu.memory_space<vmem>>, vector<1x8x16xf32>
    %299 = vector.shape_cast %298 : vector<1x8x16xf32> to vector<8x16xf32>
    %cst_102 = arith.constant 2.000000e+00 : f32
    %300 = vector.broadcast %cst_102 : f32 to vector<8x16xf32>
    %301 = arith.mulf %300, %285 : vector<8x16xf32>
    %302 = arith.subf %301, %237 : vector<8x16xf32>
    %303 = vector.broadcast %295 : f32 to vector<8x16xf32>
    %304 = arith.mulf %274, %303 : vector<8x16xf32>
    %305 = arith.addf %302, %304 : vector<8x16xf32>
    %306 = arith.mulf %275, %299 : vector<8x16xf32>
    %307 = arith.addf %305, %306 : vector<8x16xf32>
    %c96_103 = arith.constant 96 : index
    %c0_104 = arith.constant 0 : index
    %308 = vector.load %arg4[%c96_103, %c0_104] : memref<288x64xbf16, #tpu.memory_space<vmem>>, vector<16x64xbf16>
    %309 = arith.truncf %307 : vector<8x16xf32> to vector<8x16xbf16>
    %cst_105 = arith.constant dense<0.000000e+00> : vector<8x64xf32>
    %310 = tpu.matmul %309, %308, %cst_105 {dimension_numbers = #tpu.dot_dimension_numbers<[1], [0], [0], [1], [0, 0, 1, 1], [], []>} : vector<8x16xbf16>, vector<16x64xbf16>, vector<8x64xf32> -> vector<8x64xf32>
    %311 = vector.broadcast %291 : f32 to vector<1x64xf32>
    %312 = arith.mulf %311, %3 : vector<1x64xf32>
    %313 = vector.broadcast %312 : vector<1x64xf32> to vector<8x64xf32>
    %314 = arith.addf %310, %313 : vector<8x64xf32>
    %315 = vector.broadcast %4 : vector<1x64xf32> to vector<8x64xf32>
    %316 = arith.addf %314, %315 : vector<8x64xf32>
    %cst_106 = arith.constant 0.908999979 : f32
    %317 = vector.broadcast %cst_106 : f32 to vector<8x64xf32>
    %318 = arith.mulf %317, %316 : vector<8x64xf32>
    %319 = arith.negf %316 : vector<8x64xf32>
    %320 = math.exp %319 : vector<8x64xf32>
    %cst_107 = arith.constant 1.000000e+00 : f32
    %321 = vector.broadcast %cst_107 : f32 to vector<8x64xf32>
    %322 = arith.addf %321, %320 : vector<8x64xf32>
    %323 = arith.divf %321, %322 : vector<8x64xf32>
    %324 = arith.mulf %318, %323 : vector<8x64xf32>
    %c128_108 = arith.constant 128 : index
    %c0_109 = arith.constant 0 : index
    %325 = vector.load %arg4[%c128_108, %c0_109] : memref<288x64xbf16, #tpu.memory_space<vmem>>, vector<64x64xbf16>
    %326 = arith.truncf %324 : vector<8x64xf32> to vector<8x64xbf16>
    %cst_110 = arith.constant dense<0.000000e+00> : vector<8x64xf32>
    %327 = tpu.matmul %326, %325, %cst_110 {dimension_numbers = #tpu.dot_dimension_numbers<[1], [0], [0], [1], [0, 0, 1, 1], [], []>} : vector<8x64xbf16>, vector<64x64xbf16>, vector<8x64xf32> -> vector<8x64xf32>
    %328 = vector.broadcast %5 : vector<1x64xf32> to vector<8x64xf32>
    %329 = arith.addf %327, %328 : vector<8x64xf32>
    %cst_111 = arith.constant 0.908999979 : f32
    %330 = vector.broadcast %cst_111 : f32 to vector<8x64xf32>
    %331 = arith.mulf %330, %329 : vector<8x64xf32>
    %332 = arith.negf %329 : vector<8x64xf32>
    %333 = math.exp %332 : vector<8x64xf32>
    %cst_112 = arith.constant 1.000000e+00 : f32
    %334 = vector.broadcast %cst_112 : f32 to vector<8x64xf32>
    %335 = arith.addf %334, %333 : vector<8x64xf32>
    %336 = arith.divf %334, %335 : vector<8x64xf32>
    %337 = arith.mulf %331, %336 : vector<8x64xf32>
    %c192_113 = arith.constant 192 : index
    %c0_114 = arith.constant 0 : index
    %338 = vector.load %arg4[%c192_113, %c0_114] : memref<288x64xbf16, #tpu.memory_space<vmem>>, vector<64x32xbf16>
    %339 = arith.truncf %337 : vector<8x64xf32> to vector<8x64xbf16>
    %cst_115 = arith.constant dense<0.000000e+00> : vector<8x32xf32>
    %340 = tpu.matmul %339, %338, %cst_115 {dimension_numbers = #tpu.dot_dimension_numbers<[1], [0], [0], [1], [0, 0, 1, 1], [], []>} : vector<8x64xbf16>, vector<64x32xbf16>, vector<8x32xf32> -> vector<8x32xf32>
    %341 = vector.broadcast %6 : vector<1x32xf32> to vector<8x32xf32>
    %342 = arith.addf %340, %341 : vector<8x32xf32>
    %343 = math.tanh %342 : vector<8x32xf32>
    %344 = vector.extract_strided_slice %343 {offsets = [0, 0], sizes = [8, 16], strides = [1, 1]} : vector<8x32xf32> to vector<8x16xf32>
    %345 = vector.extract_strided_slice %343 {offsets = [0, 16], sizes = [8, 16], strides = [1, 1]} : vector<8x32xf32> to vector<8x16xf32>
    %346 = arith.addf %274, %344 : vector<8x16xf32>
    %cst_116 = arith.constant 5.000000e-01 : f32
    %347 = arith.mulf %cst_116, %295 : f32
    %348 = vector.broadcast %347 : f32 to vector<8x16xf32>
    %349 = arith.mulf %346, %348 : vector<8x16xf32>
    %350 = arith.addf %285, %349 : vector<8x16xf32>
    %351 = arith.addf %275, %345 : vector<8x16xf32>
    %cst_117 = arith.constant 5.000000e-01 : f32
    %352 = vector.broadcast %cst_117 : f32 to vector<8x16xf32>
    %353 = arith.mulf %352, %299 : vector<8x16xf32>
    %354 = arith.mulf %351, %353 : vector<8x16xf32>
    %355 = arith.addf %350, %354 : vector<8x16xf32>
    %c8_i32_118 = arith.constant 8 : i32
    %356 = arith.muli %c4_i32, %c8_i32_118 : i32
    %357 = tpu.assume_multiple %356, 8 : i32
    %358 = arith.index_cast %357 : i32 to index
    %c0_119 = arith.constant 0 : index
    %359 = vector.load %arg7[%358, %c0_119] : memref<64x16xf32, #tpu.memory_space<vmem>>, vector<8x16xf32>
    tpu.vector_store %arg7[%358, %c0_119], %355 {strides = array<i32>} : memref<64x16xf32, #tpu.memory_space<vmem>>, vector<8x16xf32>,
    %c5_i32 = arith.constant 5 : i32
    %360 = arith.index_cast %c5_i32 : i32 to index
    %361 = memref.load %arg0[%360] : memref<8xf32, #tpu.memory_space<smem>>
    %c1_i32_120 = arith.constant 1 : i32
    %362 = arith.subi %c5_i32, %c1_i32_120 : i32
    %363 = arith.index_cast %362 : i32 to index
    %364 = memref.load %arg0[%363] : memref<8xf32, #tpu.memory_space<smem>>
    %365 = arith.subf %361, %364 : f32
    %c1_i32_121 = arith.constant 1 : i32
    %366 = arith.subi %c5_i32, %c1_i32_121 : i32
    %367 = arith.index_cast %366 : i32 to index
    %c0_122 = arith.constant 0 : index
    %c0_123 = arith.constant 0 : index
    %368 = vector.load %arg1[%367, %c0_122, %c0_123] : memref<7x8x16xf32, #tpu.memory_space<vmem>>, vector<1x8x16xf32>
    %369 = vector.shape_cast %368 : vector<1x8x16xf32> to vector<8x16xf32>
    %cst_124 = arith.constant 2.000000e+00 : f32
    %370 = vector.broadcast %cst_124 : f32 to vector<8x16xf32>
    %371 = arith.mulf %370, %355 : vector<8x16xf32>
    %372 = arith.subf %371, %307 : vector<8x16xf32>
    %373 = vector.broadcast %365 : f32 to vector<8x16xf32>
    %374 = arith.mulf %344, %373 : vector<8x16xf32>
    %375 = arith.addf %372, %374 : vector<8x16xf32>
    %376 = arith.mulf %345, %369 : vector<8x16xf32>
    %377 = arith.addf %375, %376 : vector<8x16xf32>
    %c96_125 = arith.constant 96 : index
    %c0_126 = arith.constant 0 : index
    %378 = vector.load %arg4[%c96_125, %c0_126] : memref<288x64xbf16, #tpu.memory_space<vmem>>, vector<16x64xbf16>
    %379 = arith.truncf %377 : vector<8x16xf32> to vector<8x16xbf16>
    %cst_127 = arith.constant dense<0.000000e+00> : vector<8x64xf32>
    %380 = tpu.matmul %379, %378, %cst_127 {dimension_numbers = #tpu.dot_dimension_numbers<[1], [0], [0], [1], [0, 0, 1, 1], [], []>} : vector<8x16xbf16>, vector<16x64xbf16>, vector<8x64xf32> -> vector<8x64xf32>
    %381 = vector.broadcast %361 : f32 to vector<1x64xf32>
    %382 = arith.mulf %381, %3 : vector<1x64xf32>
    %383 = vector.broadcast %382 : vector<1x64xf32> to vector<8x64xf32>
    %384 = arith.addf %380, %383 : vector<8x64xf32>
    %385 = vector.broadcast %4 : vector<1x64xf32> to vector<8x64xf32>
    %386 = arith.addf %384, %385 : vector<8x64xf32>
    %cst_128 = arith.constant 0.908999979 : f32
    %387 = vector.broadcast %cst_128 : f32 to vector<8x64xf32>
    %388 = arith.mulf %387, %386 : vector<8x64xf32>
    %389 = arith.negf %386 : vector<8x64xf32>
    %390 = math.exp %389 : vector<8x64xf32>
    %cst_129 = arith.constant 1.000000e+00 : f32
    %391 = vector.broadcast %cst_129 : f32 to vector<8x64xf32>
    %392 = arith.addf %391, %390 : vector<8x64xf32>
    %393 = arith.divf %391, %392 : vector<8x64xf32>
    %394 = arith.mulf %388, %393 : vector<8x64xf32>
    %c128_130 = arith.constant 128 : index
    %c0_131 = arith.constant 0 : index
    %395 = vector.load %arg4[%c128_130, %c0_131] : memref<288x64xbf16, #tpu.memory_space<vmem>>, vector<64x64xbf16>
    %396 = arith.truncf %394 : vector<8x64xf32> to vector<8x64xbf16>
    %cst_132 = arith.constant dense<0.000000e+00> : vector<8x64xf32>
    %397 = tpu.matmul %396, %395, %cst_132 {dimension_numbers = #tpu.dot_dimension_numbers<[1], [0], [0], [1], [0, 0, 1, 1], [], []>} : vector<8x64xbf16>, vector<64x64xbf16>, vector<8x64xf32> -> vector<8x64xf32>
    %398 = vector.broadcast %5 : vector<1x64xf32> to vector<8x64xf32>
    %399 = arith.addf %397, %398 : vector<8x64xf32>
    %cst_133 = arith.constant 0.908999979 : f32
    %400 = vector.broadcast %cst_133 : f32 to vector<8x64xf32>
    %401 = arith.mulf %400, %399 : vector<8x64xf32>
    %402 = arith.negf %399 : vector<8x64xf32>
    %403 = math.exp %402 : vector<8x64xf32>
    %cst_134 = arith.constant 1.000000e+00 : f32
    %404 = vector.broadcast %cst_134 : f32 to vector<8x64xf32>
    %405 = arith.addf %404, %403 : vector<8x64xf32>
    %406 = arith.divf %404, %405 : vector<8x64xf32>
    %407 = arith.mulf %401, %406 : vector<8x64xf32>
    %c192_135 = arith.constant 192 : index
    %c0_136 = arith.constant 0 : index
    %408 = vector.load %arg4[%c192_135, %c0_136] : memref<288x64xbf16, #tpu.memory_space<vmem>>, vector<64x32xbf16>
    %409 = arith.truncf %407 : vector<8x64xf32> to vector<8x64xbf16>
    %cst_137 = arith.constant dense<0.000000e+00> : vector<8x32xf32>
    %410 = tpu.matmul %409, %408, %cst_137 {dimension_numbers = #tpu.dot_dimension_numbers<[1], [0], [0], [1], [0, 0, 1, 1], [], []>} : vector<8x64xbf16>, vector<64x32xbf16>, vector<8x32xf32> -> vector<8x32xf32>
    %411 = vector.broadcast %6 : vector<1x32xf32> to vector<8x32xf32>
    %412 = arith.addf %410, %411 : vector<8x32xf32>
    %413 = math.tanh %412 : vector<8x32xf32>
    %414 = vector.extract_strided_slice %413 {offsets = [0, 0], sizes = [8, 16], strides = [1, 1]} : vector<8x32xf32> to vector<8x16xf32>
    %415 = vector.extract_strided_slice %413 {offsets = [0, 16], sizes = [8, 16], strides = [1, 1]} : vector<8x32xf32> to vector<8x16xf32>
    %416 = arith.addf %344, %414 : vector<8x16xf32>
    %cst_138 = arith.constant 5.000000e-01 : f32
    %417 = arith.mulf %cst_138, %365 : f32
    %418 = vector.broadcast %417 : f32 to vector<8x16xf32>
    %419 = arith.mulf %416, %418 : vector<8x16xf32>
    %420 = arith.addf %355, %419 : vector<8x16xf32>
    %421 = arith.addf %345, %415 : vector<8x16xf32>
    %cst_139 = arith.constant 5.000000e-01 : f32
    %422 = vector.broadcast %cst_139 : f32 to vector<8x16xf32>
    %423 = arith.mulf %422, %369 : vector<8x16xf32>
    %424 = arith.mulf %421, %423 : vector<8x16xf32>
    %425 = arith.addf %420, %424 : vector<8x16xf32>
    %c8_i32_140 = arith.constant 8 : i32
    %426 = arith.muli %c5_i32, %c8_i32_140 : i32
    %427 = tpu.assume_multiple %426, 8 : i32
    %428 = arith.index_cast %427 : i32 to index
    %c0_141 = arith.constant 0 : index
    %429 = vector.load %arg7[%428, %c0_141] : memref<64x16xf32, #tpu.memory_space<vmem>>, vector<8x16xf32>
    tpu.vector_store %arg7[%428, %c0_141], %425 {strides = array<i32>} : memref<64x16xf32, #tpu.memory_space<vmem>>, vector<8x16xf32>,
    %c6_i32 = arith.constant 6 : i32
    %430 = arith.index_cast %c6_i32 : i32 to index
    %431 = memref.load %arg0[%430] : memref<8xf32, #tpu.memory_space<smem>>
    %c1_i32_142 = arith.constant 1 : i32
    %432 = arith.subi %c6_i32, %c1_i32_142 : i32
    %433 = arith.index_cast %432 : i32 to index
    %434 = memref.load %arg0[%433] : memref<8xf32, #tpu.memory_space<smem>>
    %435 = arith.subf %431, %434 : f32
    %c1_i32_143 = arith.constant 1 : i32
    %436 = arith.subi %c6_i32, %c1_i32_143 : i32
    %437 = arith.index_cast %436 : i32 to index
    %c0_144 = arith.constant 0 : index
    %c0_145 = arith.constant 0 : index
    %438 = vector.load %arg1[%437, %c0_144, %c0_145] : memref<7x8x16xf32, #tpu.memory_space<vmem>>, vector<1x8x16xf32>
    %439 = vector.shape_cast %438 : vector<1x8x16xf32> to vector<8x16xf32>
    %cst_146 = arith.constant 2.000000e+00 : f32
    %440 = vector.broadcast %cst_146 : f32 to vector<8x16xf32>
    %441 = arith.mulf %440, %425 : vector<8x16xf32>
    %442 = arith.subf %441, %377 : vector<8x16xf32>
    %443 = vector.broadcast %435 : f32 to vector<8x16xf32>
    %444 = arith.mulf %414, %443 : vector<8x16xf32>
    %445 = arith.addf %442, %444 : vector<8x16xf32>
    %446 = arith.mulf %415, %439 : vector<8x16xf32>
    %447 = arith.addf %445, %446 : vector<8x16xf32>
    %c96_147 = arith.constant 96 : index
    %c0_148 = arith.constant 0 : index
    %448 = vector.load %arg4[%c96_147, %c0_148] : memref<288x64xbf16, #tpu.memory_space<vmem>>, vector<16x64xbf16>
    %449 = arith.truncf %447 : vector<8x16xf32> to vector<8x16xbf16>
    %cst_149 = arith.constant dense<0.000000e+00> : vector<8x64xf32>
    %450 = tpu.matmul %449, %448, %cst_149 {dimension_numbers = #tpu.dot_dimension_numbers<[1], [0], [0], [1], [0, 0, 1, 1], [], []>} : vector<8x16xbf16>, vector<16x64xbf16>, vector<8x64xf32> -> vector<8x64xf32>
    %451 = vector.broadcast %431 : f32 to vector<1x64xf32>
    %452 = arith.mulf %451, %3 : vector<1x64xf32>
    %453 = vector.broadcast %452 : vector<1x64xf32> to vector<8x64xf32>
    %454 = arith.addf %450, %453 : vector<8x64xf32>
    %455 = vector.broadcast %4 : vector<1x64xf32> to vector<8x64xf32>
    %456 = arith.addf %454, %455 : vector<8x64xf32>
    %cst_150 = arith.constant 0.908999979 : f32
    %457 = vector.broadcast %cst_150 : f32 to vector<8x64xf32>
    %458 = arith.mulf %457, %456 : vector<8x64xf32>
    %459 = arith.negf %456 : vector<8x64xf32>
    %460 = math.exp %459 : vector<8x64xf32>
    %cst_151 = arith.constant 1.000000e+00 : f32
    %461 = vector.broadcast %cst_151 : f32 to vector<8x64xf32>
    %462 = arith.addf %461, %460 : vector<8x64xf32>
    %463 = arith.divf %461, %462 : vector<8x64xf32>
    %464 = arith.mulf %458, %463 : vector<8x64xf32>
    %c128_152 = arith.constant 128 : index
    %c0_153 = arith.constant 0 : index
    %465 = vector.load %arg4[%c128_152, %c0_153] : memref<288x64xbf16, #tpu.memory_space<vmem>>, vector<64x64xbf16>
    %466 = arith.truncf %464 : vector<8x64xf32> to vector<8x64xbf16>
    %cst_154 = arith.constant dense<0.000000e+00> : vector<8x64xf32>
    %467 = tpu.matmul %466, %465, %cst_154 {dimension_numbers = #tpu.dot_dimension_numbers<[1], [0], [0], [1], [0, 0, 1, 1], [], []>} : vector<8x64xbf16>, vector<64x64xbf16>, vector<8x64xf32> -> vector<8x64xf32>
    %468 = vector.broadcast %5 : vector<1x64xf32> to vector<8x64xf32>
    %469 = arith.addf %467, %468 : vector<8x64xf32>
    %cst_155 = arith.constant 0.908999979 : f32
    %470 = vector.broadcast %cst_155 : f32 to vector<8x64xf32>
    %471 = arith.mulf %470, %469 : vector<8x64xf32>
    %472 = arith.negf %469 : vector<8x64xf32>
    %473 = math.exp %472 : vector<8x64xf32>
    %cst_156 = arith.constant 1.000000e+00 : f32
    %474 = vector.broadcast %cst_156 : f32 to vector<8x64xf32>
    %475 = arith.addf %474, %473 : vector<8x64xf32>
    %476 = arith.divf %474, %475 : vector<8x64xf32>
    %477 = arith.mulf %471, %476 : vector<8x64xf32>
    %c192_157 = arith.constant 192 : index
    %c0_158 = arith.constant 0 : index
    %478 = vector.load %arg4[%c192_157, %c0_158] : memref<288x64xbf16, #tpu.memory_space<vmem>>, vector<64x32xbf16>
    %479 = arith.truncf %477 : vector<8x64xf32> to vector<8x64xbf16>
    %cst_159 = arith.constant dense<0.000000e+00> : vector<8x32xf32>
    %480 = tpu.matmul %479, %478, %cst_159 {dimension_numbers = #tpu.dot_dimension_numbers<[1], [0], [0], [1], [0, 0, 1, 1], [], []>} : vector<8x64xbf16>, vector<64x32xbf16>, vector<8x32xf32> -> vector<8x32xf32>
    %481 = vector.broadcast %6 : vector<1x32xf32> to vector<8x32xf32>
    %482 = arith.addf %480, %481 : vector<8x32xf32>
    %483 = math.tanh %482 : vector<8x32xf32>
    %484 = vector.extract_strided_slice %483 {offsets = [0, 0], sizes = [8, 16], strides = [1, 1]} : vector<8x32xf32> to vector<8x16xf32>
    %485 = vector.extract_strided_slice %483 {offsets = [0, 16], sizes = [8, 16], strides = [1, 1]} : vector<8x32xf32> to vector<8x16xf32>
    %486 = arith.addf %414, %484 : vector<8x16xf32>
    %cst_160 = arith.constant 5.000000e-01 : f32
    %487 = arith.mulf %cst_160, %435 : f32
    %488 = vector.broadcast %487 : f32 to vector<8x16xf32>
    %489 = arith.mulf %486, %488 : vector<8x16xf32>
    %490 = arith.addf %425, %489 : vector<8x16xf32>
    %491 = arith.addf %415, %485 : vector<8x16xf32>
    %cst_161 = arith.constant 5.000000e-01 : f32
    %492 = vector.broadcast %cst_161 : f32 to vector<8x16xf32>
    %493 = arith.mulf %492, %439 : vector<8x16xf32>
    %494 = arith.mulf %491, %493 : vector<8x16xf32>
    %495 = arith.addf %490, %494 : vector<8x16xf32>
    %c8_i32_162 = arith.constant 8 : i32
    %496 = arith.muli %c6_i32, %c8_i32_162 : i32
    %497 = tpu.assume_multiple %496, 8 : i32
    %498 = arith.index_cast %497 : i32 to index
    %c0_163 = arith.constant 0 : index
    %499 = vector.load %arg7[%498, %c0_163] : memref<64x16xf32, #tpu.memory_space<vmem>>, vector<8x16xf32>
    tpu.vector_store %arg7[%498, %c0_163], %495 {strides = array<i32>} : memref<64x16xf32, #tpu.memory_space<vmem>>, vector<8x16xf32>,
    %c7_i32 = arith.constant 7 : i32
    %500 = arith.index_cast %c7_i32 : i32 to index
    %501 = memref.load %arg0[%500] : memref<8xf32, #tpu.memory_space<smem>>
    %c1_i32_164 = arith.constant 1 : i32
    %502 = arith.subi %c7_i32, %c1_i32_164 : i32
    %503 = arith.index_cast %502 : i32 to index
    %504 = memref.load %arg0[%503] : memref<8xf32, #tpu.memory_space<smem>>
    %505 = arith.subf %501, %504 : f32
    %c1_i32_165 = arith.constant 1 : i32
    %506 = arith.subi %c7_i32, %c1_i32_165 : i32
    %507 = arith.index_cast %506 : i32 to index
    %c0_166 = arith.constant 0 : index
    %c0_167 = arith.constant 0 : index
    %508 = vector.load %arg1[%507, %c0_166, %c0_167] : memref<7x8x16xf32, #tpu.memory_space<vmem>>, vector<1x8x16xf32>
    %509 = vector.shape_cast %508 : vector<1x8x16xf32> to vector<8x16xf32>
    %cst_168 = arith.constant 2.000000e+00 : f32
    %510 = vector.broadcast %cst_168 : f32 to vector<8x16xf32>
    %511 = arith.mulf %510, %495 : vector<8x16xf32>
    %512 = arith.subf %511, %447 : vector<8x16xf32>
    %513 = vector.broadcast %505 : f32 to vector<8x16xf32>
    %514 = arith.mulf %484, %513 : vector<8x16xf32>
    %515 = arith.addf %512, %514 : vector<8x16xf32>
    %516 = arith.mulf %485, %509 : vector<8x16xf32>
    %517 = arith.addf %515, %516 : vector<8x16xf32>
    %c96_169 = arith.constant 96 : index
    %c0_170 = arith.constant 0 : index
    %518 = vector.load %arg4[%c96_169, %c0_170] : memref<288x64xbf16, #tpu.memory_space<vmem>>, vector<16x64xbf16>
    %519 = arith.truncf %517 : vector<8x16xf32> to vector<8x16xbf16>
    %cst_171 = arith.constant dense<0.000000e+00> : vector<8x64xf32>
    %520 = tpu.matmul %519, %518, %cst_171 {dimension_numbers = #tpu.dot_dimension_numbers<[1], [0], [0], [1], [0, 0, 1, 1], [], []>} : vector<8x16xbf16>, vector<16x64xbf16>, vector<8x64xf32> -> vector<8x64xf32>
    %521 = vector.broadcast %501 : f32 to vector<1x64xf32>
    %522 = arith.mulf %521, %3 : vector<1x64xf32>
    %523 = vector.broadcast %522 : vector<1x64xf32> to vector<8x64xf32>
    %524 = arith.addf %520, %523 : vector<8x64xf32>
    %525 = vector.broadcast %4 : vector<1x64xf32> to vector<8x64xf32>
    %526 = arith.addf %524, %525 : vector<8x64xf32>
    %cst_172 = arith.constant 0.908999979 : f32
    %527 = vector.broadcast %cst_172 : f32 to vector<8x64xf32>
    %528 = arith.mulf %527, %526 : vector<8x64xf32>
    %529 = arith.negf %526 : vector<8x64xf32>
    %530 = math.exp %529 : vector<8x64xf32>
    %cst_173 = arith.constant 1.000000e+00 : f32
    %531 = vector.broadcast %cst_173 : f32 to vector<8x64xf32>
    %532 = arith.addf %531, %530 : vector<8x64xf32>
    %533 = arith.divf %531, %532 : vector<8x64xf32>
    %534 = arith.mulf %528, %533 : vector<8x64xf32>
    %c128_174 = arith.constant 128 : index
    %c0_175 = arith.constant 0 : index
    %535 = vector.load %arg4[%c128_174, %c0_175] : memref<288x64xbf16, #tpu.memory_space<vmem>>, vector<64x64xbf16>
    %536 = arith.truncf %534 : vector<8x64xf32> to vector<8x64xbf16>
    %cst_176 = arith.constant dense<0.000000e+00> : vector<8x64xf32>
    %537 = tpu.matmul %536, %535, %cst_176 {dimension_numbers = #tpu.dot_dimension_numbers<[1], [0], [0], [1], [0, 0, 1, 1], [], []>} : vector<8x64xbf16>, vector<64x64xbf16>, vector<8x64xf32> -> vector<8x64xf32>
    %538 = vector.broadcast %5 : vector<1x64xf32> to vector<8x64xf32>
    %539 = arith.addf %537, %538 : vector<8x64xf32>
    %cst_177 = arith.constant 0.908999979 : f32
    %540 = vector.broadcast %cst_177 : f32 to vector<8x64xf32>
    %541 = arith.mulf %540, %539 : vector<8x64xf32>
    %542 = arith.negf %539 : vector<8x64xf32>
    %543 = math.exp %542 : vector<8x64xf32>
    %cst_178 = arith.constant 1.000000e+00 : f32
    %544 = vector.broadcast %cst_178 : f32 to vector<8x64xf32>
    %545 = arith.addf %544, %543 : vector<8x64xf32>
    %546 = arith.divf %544, %545 : vector<8x64xf32>
    %547 = arith.mulf %541, %546 : vector<8x64xf32>
    %c192_179 = arith.constant 192 : index
    %c0_180 = arith.constant 0 : index
    %548 = vector.load %arg4[%c192_179, %c0_180] : memref<288x64xbf16, #tpu.memory_space<vmem>>, vector<64x32xbf16>
    %549 = arith.truncf %547 : vector<8x64xf32> to vector<8x64xbf16>
    %cst_181 = arith.constant dense<0.000000e+00> : vector<8x32xf32>
    %550 = tpu.matmul %549, %548, %cst_181 {dimension_numbers = #tpu.dot_dimension_numbers<[1], [0], [0], [1], [0, 0, 1, 1], [], []>} : vector<8x64xbf16>, vector<64x32xbf16>, vector<8x32xf32> -> vector<8x32xf32>
    %551 = vector.broadcast %6 : vector<1x32xf32> to vector<8x32xf32>
    %552 = arith.addf %550, %551 : vector<8x32xf32>
    %553 = math.tanh %552 : vector<8x32xf32>
    %554 = vector.extract_strided_slice %553 {offsets = [0, 0], sizes = [8, 16], strides = [1, 1]} : vector<8x32xf32> to vector<8x16xf32>
    %555 = vector.extract_strided_slice %553 {offsets = [0, 16], sizes = [8, 16], strides = [1, 1]} : vector<8x32xf32> to vector<8x16xf32>
    %556 = arith.addf %484, %554 : vector<8x16xf32>
    %cst_182 = arith.constant 5.000000e-01 : f32
    %557 = arith.mulf %cst_182, %505 : f32
    %558 = vector.broadcast %557 : f32 to vector<8x16xf32>
    %559 = arith.mulf %556, %558 : vector<8x16xf32>
    %560 = arith.addf %495, %559 : vector<8x16xf32>
    %561 = arith.addf %485, %555 : vector<8x16xf32>
    %cst_183 = arith.constant 5.000000e-01 : f32
    %562 = vector.broadcast %cst_183 : f32 to vector<8x16xf32>
    %563 = arith.mulf %562, %509 : vector<8x16xf32>
    %564 = arith.mulf %561, %563 : vector<8x16xf32>
    %565 = arith.addf %560, %564 : vector<8x16xf32>
    %c8_i32_184 = arith.constant 8 : i32
    %566 = arith.muli %c7_i32, %c8_i32_184 : i32
    %567 = tpu.assume_multiple %566, 8 : i32
    %568 = arith.index_cast %567 : i32 to index
    %c0_185 = arith.constant 0 : index
    %569 = vector.load %arg7[%568, %c0_185] : memref<64x16xf32, #tpu.memory_space<vmem>>, vector<8x16xf32>
    tpu.vector_store %arg7[%568, %c0_185], %565 {strides = array<i32>} : memref<64x16xf32, #tpu.memory_space<vmem>>, vector<8x16xf32>,
    %c7_i32_186 = arith.constant 7 : i32
    %c0_187 = arith.constant 0 : index
    %c0_188 = arith.constant 0 : index
    %570 = vector.load %arg7[%c0_187, %c0_188] : memref<64x16xf32, #tpu.memory_space<vmem>>, vector<64x16xf32>
    %c256 = arith.constant 256 : index
    %c0_189 = arith.constant 0 : index
    %571 = vector.load %arg4[%c256, %c0_189] : memref<288x64xbf16, #tpu.memory_space<vmem>>, vector<16x4xbf16>
    %572 = arith.truncf %570 : vector<64x16xf32> to vector<64x16xbf16>
    %cst_190 = arith.constant dense<0.000000e+00> : vector<64x4xf32>
    %573 = tpu.matmul %572, %571, %cst_190 {dimension_numbers = #tpu.dot_dimension_numbers<[1], [0], [0], [1], [0, 0, 1, 1], [], []>} : vector<64x16xbf16>, vector<16x4xbf16>, vector<64x4xf32> -> vector<64x4xf32>
    %574 = vector.broadcast %7 : vector<1x4xf32> to vector<64x4xf32>
    %575 = arith.addf %573, %574 : vector<64x4xf32>
    %c0_191 = arith.constant 0 : index
    %c0_192 = arith.constant 0 : index
    %576 = vector.load %arg3[%c0_191, %c0_192] : memref<64x4xf32, #tpu.memory_space<vmem>>, vector<64x4xf32>
    %577 = arith.addf %575, %576 : vector<64x4xf32>
    %c0_193 = arith.constant 0 : index
    %c0_194 = arith.constant 0 : index
    %578 = vector.load %arg6[%c0_193, %c0_194] : memref<64x4xf32, #tpu.memory_space<vmem>>, vector<64x4xf32>
    tpu.vector_store %arg6[%c0_193, %c0_194], %577 {strides = array<i32>} : memref<64x4xf32, #tpu.memory_space<vmem>>, vector<64x4xf32>,
    return
  }
}

</mosaic_0001>

<bundles_post_ra>
// kernel: tpu_custom_call.1
= control target key start
LH: loop header
LB: loop body
LE: loop exit
PB: predicated region body
PF: predicated region fallthrough
CT: control target
= control target key end

     0   :  { %11 = vsyncpa [#allocation4], 0  ;;  %s2357_s24 = smov [#allocation3]   ;;  %s3020_s0 = inlined_call_operand.vmem [shape: f32[8], index: 0, kind: input, shape index: {}]   ;;  %s3021_s1 = inlined_call_operand.vmem [shape: f32[7,8,16], index: 1, kind: input, shape index: {}]   ;;  %s3022_s2 = inlined_call_operand.vmem [shape: f32[8,8], index: 2, kind: input, shape index: {}]   ;;  %s3023_s3 = inlined_call_operand.vmem [shape: f32[64,4], index: 3, kind: input, shape index: {}]   ;;  %s3024_s4 = inlined_call_operand.vmem [shape: bf16[288,64], index: 4, kind: input, shape index: {}]   ;;  %s3025_s5 = inlined_call_operand.vmem [shape: f32[8,64], index: 5, kind: input, shape index: {}]   ;;  %s3026_s6 = inlined_call_operand.vmem [shape: f32[64,4], index: 6, kind: output, shape index: {}]  }
   0x1   :  { %s17_s23 = sshll.u32 %s3020_s0, 4  ;;  %s18_s23 = int_to_ptr.vmem [resolvable:$true] %s17_s23 }
   0x2   :  { %20 = dma.vmem_to_smem %s18_s23, 16, %s2357_s24, [#allocation4]  }
   0x3   :  { %2355 = dma.done.wait [#allocation4], 16  }
   0x4   :  { %2356 = vsyncadd [#allocation4], 4294967280 }
   0x5   :  { %35 = sfence }
   0x6   :  { %v46_v0 = vld [vmem:[%s3024_s4] sm:$0xf]  ;;  %vm53_vm0 = vcmask 1043456   ;;  %vm49_vm1 = vcmask 64512   ;;  %v2173_v4 = vld [vmem:[%s3024_s4 + $0x18] sm:$0xff]  ;;  %v2172_v5 = vld [vmem:[%s3024_s4 + $0x10] sm:$0xff] }
   0x7   :  { %v45_v1 = vld [vmem:[%s3022_s2] sm:$0xff]  ;;  %v55_v2 = vsel %vm53_vm0, %v46_v0, 0  ;;  %119 = vmatpush.bf16.msra.mxu1 %v2173_v4  ;;  %vm109_vm6 = vcmask 261120   ;;  %v2175_v26 = vld [vmem:[%s3024_s4 + $0x28] sm:$0xff]  ;;  %v2176_v48 = vld [vmem:[%s3024_s4 + $0x30] sm:$0xff]  ;;  %vm181_vm11 = vcmask 130048  }
   0x8   :  { %v47_v3 = vpack.c.bf16 %v45_v1, %v45_v1  ;;  %64 = vmatpush.bf16.msra.mxu0 %v55_v2  ;;  %v2244_v6 = vld [vmem:[%s3025_s5] ss:$0 sm:$0xff]  ;;  %174 = vmatpush.bf16.msra.mxu2 %v2175_v26  ;;  %v2245_v28 = vld [vmem:[%s3025_s5 + $0x1] ss:$0 sm:$0xff]  ;;  %v2246_v49 = vld [vmem:[%s3025_s5 + $0x2] ss:$0 sm:$0xff] }
   0x9   :  { %v2174_v27 = vld [vmem:[%s3024_s4 + $0x20] sm:$0xff]  ;;  %206 = vmatpush.bf16.msra.mxu3 %v2176_v48  ;;  %s2437_s19 = sld [smem:[#allocation3]]  ;;  %v2180_v54 = vld [vmem:[%s3024_s4 + $0x58] sm:$0xff]  ;;  %v2179_v57 = vld [vmem:[%s3024_s4 + $0x50] sm:$0xff]  ;;  %vm269_vm0 = vcmask 523264   ;;  %s2358_s18 = smov 16  }
   0xa   :  { %v2445_v55 = vld [vmem:[%s3025_s5 + $0x3] sm:$0x1]  ;;  %v2178_v59 = vld [vmem:[%s3024_s4 + $0x48] sm:$0xff]  ;;  %v2458_v61 = vld [vmem:[%s3025_s5 + $0x4] ss:$0 sm:$0xff]  ;;  %s2359_s22 = smov 112  }
   0xb   :  { %1832 = vmatmul.msk.bf16.vlgmr.msra.gmra.mxu0 %vm49_vm1, %v47_v3  ;;  %120 = vmatpush.bf16.msra.mxu1 %v2172_v5  ;;  %v2177_v63 = vld [vmem:[%s3024_s4 + $0x40] sm:$0xff]  ;;  %s2501_s23 = sld [smem:[#allocation3 + $0x1]] }
   0xc   :  { %175 = vmatpush.bf16.msra.mxu2 %v2174_v27  ;;  %v2486_v27 = vld [vmem:[%s3021_s1] sm:$0xff]  ;;  %s2541_s0 = sld [smem:[#allocation3 + $0x2]] }
   0xd   :  { %277 = vmatpush.bf16.msrb.mxu3 %v2180_v54  ;;  %367 = vrot.lane.b32.xlu0 %v2486_v27, %s2358_s18  ;;  %s2834_s2 = sld [smem:[#allocation3 + $0x6]] }
   0xe   :  { %s2120_s17 = sld [smem:[#allocation3 + $0x7]] }
   0xf   :  { %390 = vmatpush.bf16.msrb.mxu1 %v2176_v48  ;;  %v187_v56 = vstv %s2437_s19 }
  0x10   :  { %426 = vmatpush.bf16.msrb.mxu2 %v2180_v54  ;;  %v188_v58 = vmul.f32 %v187_v56, %v2445_v55 }
  0x11   :  { %278 = vmatpush.bf16.msrb.mxu3 %v2179_v57  ;;  %s2505_s24 = ssub.f32 %s2501_s23, %s2437_s19 }
  0x12   :  { %v189_v60 = vperm.slane %v188_v58, 0  ;;  %s2545_s29 = ssub.f32 %s2541_s0, %s2501_s23 }
  0x13   :  { %s475_s28 = smul.f32 0.5, %s2505_s24 }
  0x14   :  { %427 = vmatpush.bf16.msrb.mxu2 %v2179_v57  ;;  %s683_s27 = smul.f32 0.5, %s2545_s29  ;;  %s2922_s20 = ssub.f32 %s2120_s17, %s2834_s2 }
  0x15   :  { %279 = vmatpush.bf16.msrb.mxu3 %v2178_v59 }
  0x18   :  { %428 = vmatpush.bf16.msrb.mxu2 %v2178_v59 }
  0x19   :  { %280 = vmatpush.bf16.msrb.mxu3 %v2177_v63 }
  0x1c   :  { %429 = vmatpush.bf16.msrb.mxu2 %v2177_v63 }
  0x88   :  { %v66_v7 = vpop.f32.mrf.mxu0 }
  0x89   :  { %v67_v8 = vadd.f32 %v2244_v6, %v66_v7 }
  0x8b   :  { %v1833_v9 = vmul.f32 -1.442695, %v67_v8  ;;  %v70_v21 = vmul.f32 0.909, %v67_v8 }
  0x8d   :  { %2251 = vpow2.f32 %v1833_v9 }
  0x90   :  { %v68_v10 = vpop.f32.mrf.mxu0 }
  0x93   :  { %v2252_v11 = vpop.eup %2251 }
  0x94   :  { %v74_v12 = vadd.f32 1.0, %v2252_v11 }
  0x96   :  { %2253 = vrcp.f32 %v74_v12  ;;  %v86_v16 = vand.u32 2147483648, %v74_v12  ;;  %v84_v18 = vand.u32 2147483647, %v74_v12  ;;  %vm80_vm3 = vweird.f32 %v74_v12 }
  0x98   :  { %v87_v20 = vor.u32 1.1754944e-38, %v86_v16  ;;  %vm85_vm5 = vcmp.eq.f32.partialorder %v84_v18, 8.507059e+37 }
  0x9c   :  { %v2254_v13 = vpop.eup %2253 }
  0x9d   :  { %v76_v14 = vmul.f32 %v2254_v13, %v74_v12  ;;  %vm81_vm2 = vweird.f32 %v2254_v13 }
  0x9e   :  { %vm82_vm4 = vmor %vm80_vm3, %vm81_vm2 }
  0x9f   :  { %v77_v15 = vsub.f32 1.0, %v76_v14 }
  0xa1   :  { %v78_v17 = vmul.f32 %v2254_v13, %v77_v15 }
  0xa3   :  { %v79_v19 = vadd.f32 %v2254_v13, %v78_v17 }
  0xa5   :  { %v83_v22 = vsel %vm82_vm4, %v2254_v13, %v79_v19  ;;  %v2184_v19 = vld [vmem:[%s3024_s4 + $0x78] sm:$0xff] }
  0xa6   :  { %v88_v23 = vsel %vm85_vm5, %v87_v20, %v83_v22  ;;  %464 = vmatpush.bf16.msrb.mxu0 %v2184_v19  ;;  %v2183_v20 = vld [vmem:[%s3024_s4 + $0x70] sm:$0xff]  ;;  %v2477_v22 = vld [vmem:[%s3025_s5 + $0x5] ss:$0 sm:$0xff] }
  0xa7   :  { %v90_v24 = vmul.f32 %v88_v23, %v70_v21  ;;  %v2182_v21 = vld [vmem:[%s3024_s4 + $0x68] sm:$0xff]  ;;  %v2181_v23 = vld [vmem:[%s3024_s4 + $0x60] sm:$0xff] }
  0xa9   :  { %v95_v25 = vpack.c.bf16 %v90_v24, %v90_v24 }
  0xaa   :  { %465 = vmatpush.bf16.msrb.mxu0 %v2183_v20 }
  0xab   :  { %1842 = vmatmul.msk.bf16.vlgmr.msra.gmra.mxu1 %vm109_vm6, %v95_v25 }
  0xae   :  { %466 = vmatpush.bf16.msrb.mxu0 %v2182_v21 }
  0xb2   :  { %467 = vmatpush.bf16.msrb.mxu0 %v2181_v23 }
 0x128   :  { %v122_v29 = vpop.f32.mrf.mxu1 }
 0x129   :  { %v123_v30 = vadd.f32 %v2245_v28, %v122_v29 }
 0x12b   :  { %v1843_v31 = vmul.f32 -1.442695, %v123_v30  ;;  %v126_v43 = vmul.f32 0.909, %v123_v30 }
 0x12d   :  { %2255 = vpow2.f32 %v1843_v31 }
 0x130   :  { %v124_v32 = vpop.f32.mrf.mxu1 }
 0x133   :  { %v2256_v33 = vpop.eup %2255 }
 0x134   :  { %v130_v34 = vadd.f32 1.0, %v2256_v33 }
 0x136   :  { %2257 = vrcp.f32 %v130_v34  ;;  %v142_v38 = vand.u32 2147483648, %v130_v34  ;;  %v140_v40 = vand.u32 2147483647, %v130_v34  ;;  %vm136_vm8 = vweird.f32 %v130_v34 }
 0x138   :  { %v143_v42 = vor.u32 1.1754944e-38, %v142_v38  ;;  %vm141_vm10 = vcmp.eq.f32.partialorder %v140_v40, 8.507059e+37 }
 0x13c   :  { %v2258_v35 = vpop.eup %2257 }
 0x13d   :  { %v132_v36 = vmul.f32 %v2258_v35, %v130_v34  ;;  %vm137_vm7 = vweird.f32 %v2258_v35 }
 0x13e   :  { %vm138_vm9 = vmor %vm136_vm8, %vm137_vm7 }
 0x13f   :  { %v133_v37 = vsub.f32 1.0, %v132_v36 }
 0x141   :  { %v134_v39 = vmul.f32 %v2258_v35, %v133_v37 }
 0x143   :  { %v135_v41 = vadd.f32 %v2258_v35, %v134_v39 }
 0x145   :  { %v139_v44 = vsel %vm138_vm9, %v2258_v35, %v135_v41 }
 0x146   :  { %v144_v45 = vsel %vm141_vm10, %v143_v42, %v139_v44  ;;  %v2494_v44 = vld [vmem:[%s3025_s5 + $0x6] ss:$0 sm:$0xff] }
 0x147   :  { %v146_v46 = vmul.f32 %v144_v45, %v126_v43 }
 0x149   :  { %v151_v47 = vpack.c.bf16 %v146_v46, %v146_v46 }
 0x14b   :  { %1852 = vmatmul.msk.bf16.vlgmr.msra.gmra.mxu2 %vm109_vm6, %v151_v47  ;;  %v368_v47 = vpop.permute.xlu0 %367 }
 0x1ce   :  { %v177_v50 = vpop.f32.mrf.mxu2 }
 0x1cf   :  { %v2430_v51 = vadd.f32 %v2246_v49, %v177_v50 }
 0x1d1   :  { %182 = vst.msk [vmem:[#allocation2] sm:$0xff] %vm181_vm11, %v2430_v51  ;;  %v186_v52 = vpack.c.bf16 %v2430_v51, %v2430_v51 }
 0x1d3   :  { %1857 = vmatmul.msk.bf16.vlgmr.msra.gmra.mxu3 %vm181_vm11, %v186_v52  ;;  %v363_v52 = vstv %s2505_s24 }
 0x1d4   :  { %348 = vmatpush.bf16.msra.mxu3 %v2184_v19 }
 0x1d6   :  { %v179_v53 = vpop.f32.mrf.mxu2 }
 0x1d7   :  { %v361_v53 = vmul.f32 2.0, %v2430_v51 }
 0x1d8   :  { %349 = vmatpush.bf16.msra.mxu3 %v2183_v20 }
 0x1d9   :  { %v362_v56 = vsub.f32 %v361_v53, %v2430_v51 }
 0x1dc   :  { %350 = vmatpush.bf16.msra.mxu3 %v2182_v21 }
 0x1e0   :  { %351 = vmatpush.bf16.msra.mxu3 %v2181_v23 }
 0x256   :  { %v208_v62 = vpop.f32.mrf.mxu3 }
 0x257   :  { %v209_v0 = vadd.f32 %v208_v62, %v189_v60  ;;  %v377_v62 = vstv %s2501_s23 }
 0x258   :  { %v378_v63 = vmul.f32 %v377_v62, %v2445_v55 }
 0x259   :  { %v213_v1 = vadd.f32 %v2458_v61, %v209_v0 }
 0x25a   :  { %v379_v0 = vperm.slane %v378_v63, 0 }
 0x25b   :  { %v1858_v2 = vmul.f32 -1.442695, %v213_v1  ;;  %v214_v14 = vmul.f32 0.909, %v213_v1 }
 0x25d   :  { %2259 = vpow2.f32 %v1858_v2 }
 0x25e   :  { %v210_v3 = vpop.f32.mrf.mxu3 }
 0x263   :  { %v2260_v4 = vpop.eup %2259 }
 0x264   :  { %v218_v5 = vadd.f32 1.0, %v2260_v4 }
 0x266   :  { %2261 = vrcp.f32 %v218_v5  ;;  %v230_v9 = vand.u32 2147483648, %v218_v5  ;;  %v228_v11 = vand.u32 2147483647, %v218_v5  ;;  %vm224_vm13 = vweird.f32 %v218_v5 }
 0x268   :  { %v231_v13 = vor.u32 1.1754944e-38, %v230_v9  ;;  %vm229_vm15 = vcmp.eq.f32.partialorder %v228_v11, 8.507059e+37 }
 0x26c   :  { %v2262_v6 = vpop.eup %2261 }
 0x26d   :  { %v220_v7 = vmul.f32 %v2262_v6, %v218_v5  ;;  %vm225_vm12 = vweird.f32 %v2262_v6 }
 0x26e   :  { %vm226_vm14 = vmor %vm224_vm13, %vm225_vm12 }
 0x26f   :  { %v221_v8 = vsub.f32 1.0, %v220_v7 }
 0x271   :  { %v222_v10 = vmul.f32 %v2262_v6, %v221_v8 }
 0x273   :  { %v223_v12 = vadd.f32 %v2262_v6, %v222_v10 }
 0x275   :  { %v227_v15 = vsel %vm226_vm14, %v2262_v6, %v223_v12 }
 0x276   :  { %v232_v16 = vsel %vm229_vm15, %v231_v13, %v227_v15 }
 0x277   :  { %v234_v17 = vmul.f32 %v232_v16, %v214_v14 }
 0x279   :  { %v243_v18 = vpack.c.bf16 %v234_v17, %v234_v17 }
 0x27b   :  { %1875 = vmatmul.msk.bf16.vlgmr.msrb.gmra.mxu3 %vm269_vm0, %v243_v18 }
 0x2fe   :  { %v282_v24 = vpop.f32.mrf.mxu3 }
 0x2ff   :  { %v283_v25 = vadd.f32 %v2477_v22, %v282_v24 }
 0x301   :  { %v1876_v26 = vmul.f32 -1.442695, %v283_v25  ;;  %v286_v39 = vmul.f32 0.909, %v283_v25  ;;  %v479_v25 = vmul.f32 0.5, %v2486_v27 }
 0x303   :  { %2263 = vpow2.f32 %v1876_v26  ;;  %v1902_v26 = vld [vmem:[%s3021_s1 + $0x8] sm:$0xff]  ;;  %481 = vrot.lane.b32.xlu1 %v479_v25, %s2358_s18 }
 0x306   :  { %v284_v28 = vpop.f32.mrf.mxu3 }
 0x307   :  { %v687_v28 = vmul.f32 0.5, %v1902_v26 }
 0x309   :  { %v2264_v29 = vpop.eup %2263 }
 0x30a   :  { %v290_v30 = vadd.f32 1.0, %v2264_v29 }
 0x30b   :  { %503 = vrot.lane.b32.xlu1 %v1902_v26, %s2358_s18 }
 0x30c   :  { %2265 = vrcp.f32 %v290_v30  ;;  %v302_v34 = vand.u32 2147483648, %v290_v30  ;;  %v300_v36 = vand.u32 2147483647, %v290_v30  ;;  %vm296_vm2 = vweird.f32 %v290_v30 }
 0x30e   :  { %v303_v38 = vor.u32 1.1754944e-38, %v302_v34  ;;  %vm301_vm4 = vcmp.eq.f32.partialorder %v300_v36, 8.507059e+37 }
 0x312   :  { %v2266_v31 = vpop.eup %2265 }
 0x313   :  { %v292_v32 = vmul.f32 %v2266_v31, %v290_v30  ;;  %vm297_vm1 = vweird.f32 %v2266_v31 }
 0x314   :  { %vm298_vm3 = vmor %vm296_vm2, %vm297_vm1 }
 0x315   :  { %v293_v33 = vsub.f32 1.0, %v292_v32 }
 0x317   :  { %v294_v35 = vmul.f32 %v2266_v31, %v293_v33 }
 0x319   :  { %v295_v37 = vadd.f32 %v2266_v31, %v294_v35 }
 0x31b   :  { %v299_v40 = vsel %vm298_vm3, %v2266_v31, %v295_v37 }
 0x31c   :  { %v304_v41 = vsel %vm301_vm4, %v303_v38, %v299_v40 }
 0x31d   :  { %v306_v42 = vmul.f32 %v304_v41, %v286_v39 }
 0x31f   :  { %v315_v43 = vpack.c.bf16 %v306_v42, %v306_v42 }
 0x321   :  { %1893 = vmatmul.msk.bf16.vlgmr.msra.gmra.mxu3 %vm269_vm0, %v315_v43 }
 0x3a4   :  { %v353_v45 = vpop.f32.mrf.mxu3 }
 0x3a5   :  { %v354_v46 = vadd.f32 %v2494_v44, %v353_v45  ;;  %v2185_v45 = vld [vmem:[%s3024_s4 + $0x30] sm:$0xff] }
 0x3a6   :  { %534 = vmatpush.bf16.msrb.mxu3 %v2185_v45 }
 0x3a7   :  { %2267 = vtanh.f32 %v354_v46 }
 0x3ac   :  { %v355_v48 = vpop.f32.mrf.mxu3 }
 0x3ad   :  { %v2497_v49 = vpop.eup %2267  ;;  %v482_v48 = vpop.permute.xlu1 %481 }
 0x3ae   :  { %v370_v50 = vmul.f32 %v2497_v49, %v368_v47  ;;  %v364_v54 = vmul.f32 %v2497_v49, %v363_v52 }
 0x3b0   :  { %372 = vrot.lane.b32.xlu0 %v370_v50, %s2359_s22  ;;  %v365_v57 = vadd.f32 %v364_v54, %v362_v56 }
 0x3b5   :  { %v504_v56 = vpop.permute.xlu1 %503 }
 0x3b8   :  { %689 = vrot.lane.b32.xlu0 %v687_v28, %s2358_s18 }
 0x422   :  { %v373_v58 = vpop.permute.xlu0 %372 }
 0x423   :  { %v2511_v59 = vadd.f32 %v373_v58, %v365_v57  ;;  %v476_v58 = vstv %s475_s28  ;;  %s2613_s28 = sld [smem:[#allocation3 + $0x3]] }
 0x425   :  { %v376_v60 = vpack.c.bf16 %v2511_v59, %v2511_v59 }
 0x427   :  { %1895 = vmatmul.msk.bf16.vlgmr.msrb.gmra.mxu1 %vm181_vm11, %v376_v60 }
 0x429   :  { %s2617_s30 = ssub.f32 %s2613_s28, %s2541_s0 }
 0x42b   :  { %s891_s26 = smul.f32 0.5, %s2617_s30 }
 0x4a4   :  { %v392_v1 = vpop.f32.mrf.mxu1 }
 0x4a5   :  { %v393_v2 = vadd.f32 %v392_v1, %v379_v0  ;;  %v499_v0 = vstv %s2545_s29 }
 0x4a7   :  { %v396_v3 = vadd.f32 %v2458_v61, %v393_v2 }
 0x4a9   :  { %v1896_v4 = vmul.f32 -1.442695, %v396_v3  ;;  %v397_v16 = vmul.f32 0.909, %v396_v3 }
 0x4ab   :  { %2269 = vpow2.f32 %v1896_v4 }
 0x4ac   :  { %v394_v5 = vpop.f32.mrf.mxu1 }
 0x4b1   :  { %v2270_v6 = vpop.eup %2269 }
 0x4b2   :  { %v401_v7 = vadd.f32 1.0, %v2270_v6 }
 0x4b4   :  { %2271 = vrcp.f32 %v401_v7  ;;  %v413_v11 = vand.u32 2147483648, %v401_v7  ;;  %v411_v13 = vand.u32 2147483647, %v401_v7  ;;  %vm407_vm6 = vweird.f32 %v401_v7 }
 0x4b6   :  { %v414_v15 = vor.u32 1.1754944e-38, %v413_v11  ;;  %vm412_vm8 = vcmp.eq.f32.partialorder %v411_v13, 8.507059e+37  ;;  %v2186_v13 = vld [vmem:[%s3024_s4 + $0x40] sm:$0xff] }
 0x4ba   :  { %v2272_v8 = vpop.eup %2271 }
 0x4bb   :  { %v403_v9 = vmul.f32 %v2272_v8, %v401_v7  ;;  %vm408_vm5 = vweird.f32 %v2272_v8  ;;  %v2189_v7 = vld [vmem:[%s3024_s4 + $0x58] sm:$0xff] }
 0x4bc   :  { %vm409_vm7 = vmor %vm407_vm6, %vm408_vm5  ;;  %602 = vmatpush.bf16.msra.mxu1 %v2189_v7  ;;  %v690_v7 = vpop.permute.xlu0 %689 }
 0x4bd   :  { %v404_v10 = vsub.f32 1.0, %v403_v9  ;;  %v2188_v9 = vld [vmem:[%s3024_s4 + $0x50] sm:$0xff] }
 0x4bf   :  { %v405_v12 = vmul.f32 %v2272_v8, %v404_v10  ;;  %v2187_v10 = vld [vmem:[%s3024_s4 + $0x48] sm:$0xff] }
 0x4c0   :  { %603 = vmatpush.bf16.msra.mxu1 %v2188_v9 }
 0x4c1   :  { %v406_v14 = vadd.f32 %v2272_v8, %v405_v12 }
 0x4c3   :  { %v410_v17 = vsel %vm409_vm7, %v2272_v8, %v406_v14  ;;  %v515_v8 = vstv %s2541_s0 }
 0x4c4   :  { %v415_v18 = vsel %vm412_vm8, %v414_v15, %v410_v17  ;;  %604 = vmatpush.bf16.msra.mxu1 %v2187_v10  ;;  %v2194_v10 = vld [vmem:[%s3024_s4 + $0x30] sm:$0xff] }
 0x4c5   :  { %v417_v19 = vmul.f32 %v415_v18, %v397_v16  ;;  %742 = vmatpush.bf16.msra.mxu0 %v2194_v10 }
 0x4c7   :  { %v418_v20 = vpack.c.bf16 %v417_v19, %v417_v19 }
 0x4c8   :  { %605 = vmatpush.bf16.msra.mxu1 %v2186_v13 }
 0x4c9   :  { %1897 = vmatmul.msk.bf16.vlgmr.msrb.gmra.mxu2 %vm269_vm0, %v418_v20 }
 0x54c   :  { %v431_v21 = vpop.f32.mrf.mxu2 }
 0x54d   :  { %v432_v23 = vadd.f32 %v2477_v22, %v431_v21 }
 0x54f   :  { %v1898_v24 = vmul.f32 -1.442695, %v432_v23  ;;  %v435_v39 = vmul.f32 0.909, %v432_v23 }
 0x551   :  { %2273 = vpow2.f32 %v1898_v24 }
 0x554   :  { %v433_v29 = vpop.f32.mrf.mxu2 }
 0x557   :  { %v2274_v30 = vpop.eup %2273 }
 0x558   :  { %v439_v31 = vadd.f32 1.0, %v2274_v30 }
 0x55a   :  { %2275 = vrcp.f32 %v439_v31  ;;  %v451_v27 = vand.u32 2147483648, %v439_v31  ;;  %v449_v36 = vand.u32 2147483647, %v439_v31  ;;  %vm445_vm10 = vweird.f32 %v439_v31 }
 0x55c   :  { %v452_v38 = vor.u32 1.1754944e-38, %v451_v27  ;;  %vm450_vm13 = vcmp.eq.f32.partialorder %v449_v36, 8.507059e+37  ;;  %v2193_v27 = vld [vmem:[%s3024_s4 + $0x78] sm:$0xff]  ;;  %v2191_v36 = vld [vmem:[%s3024_s4 + $0x68] sm:$0xff] }
 0x55d   :  { %672 = vmatpush.bf16.msra.mxu2 %v2193_v27 }
 0x560   :  { %v2276_v32 = vpop.eup %2275 }
 0x561   :  { %v441_v33 = vmul.f32 %v2276_v32, %v439_v31  ;;  %vm446_vm9 = vweird.f32 %v2276_v32 }
 0x562   :  { %vm447_vm12 = vmor %vm445_vm10, %vm446_vm9 }
 0x563   :  { %v442_v34 = vsub.f32 1.0, %v441_v33 }
 0x565   :  { %v443_v35 = vmul.f32 %v2276_v32, %v442_v34 }
 0x567   :  { %v444_v37 = vadd.f32 %v2276_v32, %v443_v35  ;;  %v2192_v35 = vld [vmem:[%s3024_s4 + $0x70] sm:$0xff] }
 0x568   :  { %673 = vmatpush.bf16.msra.mxu2 %v2192_v35 }
 0x569   :  { %v448_v40 = vsel %vm447_vm12, %v2276_v32, %v444_v37  ;;  %v2190_v37 = vld [vmem:[%s3024_s4 + $0x60] sm:$0xff] }
 0x56a   :  { %v453_v41 = vsel %vm450_vm13, %v452_v38, %v448_v40 }
 0x56b   :  { %v455_v42 = vmul.f32 %v453_v41, %v435_v39  ;;  %v1946_v41 = vld [vmem:[%s3021_s1 + $0x10] sm:$0xff] }
 0x56c   :  { %674 = vmatpush.bf16.msra.mxu2 %v2191_v36  ;;  %711 = vrot.lane.b32.xlu1 %v1946_v41, %s2358_s18 }
 0x56d   :  { %v456_v43 = vpack.c.bf16 %v455_v42, %v455_v42 }
 0x56f   :  { %1899 = vmatmul.msk.bf16.vlgmr.msrb.gmra.mxu0 %vm269_vm0, %v456_v43  ;;  %v895_v43 = vmul.f32 0.5, %v1946_v41 }
 0x570   :  { %675 = vmatpush.bf16.msra.mxu2 %v2190_v37 }
 0x574   :  { %897 = vrot.lane.b32.xlu1 %v895_v43, %s2358_s18 }
 0x5ec   :  { %v469_v46 = vpop.f32.mrf.mxu0 }
 0x5ed   :  { %v470_v47 = vadd.f32 %v2494_v44, %v469_v46 }
 0x5ef   :  { %2277 = vtanh.f32 %v470_v47 }
 0x5f4   :  { %v471_v50 = vpop.f32.mrf.mxu0 }
 0x5f5   :  { %v2533_v52 = vpop.eup %2277 }
 0x5f6   :  { %v474_v53 = vadd.f32 %v2533_v52, %v2497_v49  ;;  %v506_v57 = vmul.f32 %v2533_v52, %v504_v56  ;;  %v500_v2 = vmul.f32 %v2533_v52, %v499_v0 }
 0x5f8   :  { %v484_v54 = vmul.f32 %v482_v48, %v474_v53  ;;  %v477_v60 = vmul.f32 %v476_v58, %v474_v53 }
 0x5fa   :  { %486 = vrot.lane.b32.xlu2 %v484_v54, %s2359_s22  ;;  %v478_v49 = vadd.f32 %v477_v60, %v2430_v51 }
 0x602   :  { %508 = vrot.lane.b32.xlu2 %v506_v57, %s2359_s22 }
 0x654   :  { %v487_v62 = vpop.permute.xlu2 %486 }
 0x655   :  { %v2548_v63 = vadd.f32 %v487_v62, %v478_v49 }
 0x657   :  { %491 = vst.msk [vmem:[#allocation2 + $0x8] sm:$0xff] %vm181_vm11, %v2548_v63  ;;  %v497_v1 = vmul.f32 2.0, %v2548_v63 }
 0x659   :  { %v498_v3 = vsub.f32 %v497_v1, %v2511_v59  ;;  %v516_v59 = vmul.f32 %v515_v8, %v2445_v55 }
 0x65b   :  { %v501_v4 = vadd.f32 %v500_v2, %v498_v3  ;;  %v517_v11 = vperm.slane %v516_v59, 0 }
 0x65c   :  { %v509_v5 = vpop.permute.xlu2 %508 }
 0x65d   :  { %v2556_v6 = vadd.f32 %v509_v5, %v501_v4  ;;  %v712_v4 = vpop.permute.xlu1 %711 }
 0x65f   :  { %v514_v51 = vpack.c.bf16 %v2556_v6, %v2556_v6 }
 0x661   :  { %1907 = vmatmul.msk.bf16.vlgmr.msrb.gmra.mxu3 %vm181_vm11, %v514_v51 }
 0x6e4   :  { %v536_v12 = vpop.f32.mrf.mxu3 }
 0x6e5   :  { %v537_v14 = vadd.f32 %v536_v12, %v517_v11  ;;  %v684_v11 = vstv %s683_s27  ;;  %s2675_s27 = sld [smem:[#allocation3 + $0x4]] }
 0x6e7   :  { %v540_v15 = vadd.f32 %v2458_v61, %v537_v14 }
 0x6e9   :  { %v1908_v16 = vmul.f32 -1.442695, %v540_v15  ;;  %v541_v30 = vmul.f32 0.909, %v540_v15 }
 0x6eb   :  { %2279 = vpow2.f32 %v1908_v16  ;;  %v707_v16 = vstv %s2617_s30  ;;  %s2679_s29 = ssub.f32 %s2675_s27, %s2613_s28 }
 0x6ec   :  { %v538_v17 = vpop.f32.mrf.mxu3 }
 0x6ed   :  { %s1099_s25 = smul.f32 0.5, %s2679_s29 }
 0x6f1   :  { %v2280_v18 = vpop.eup %2279 }
 0x6f2   :  { %v545_v19 = vadd.f32 1.0, %v2280_v18 }
 0x6f4   :  { %2281 = vrcp.f32 %v545_v19  ;;  %v557_v24 = vand.u32 2147483648, %v545_v19  ;;  %v555_v26 = vand.u32 2147483647, %v545_v19  ;;  %vm551_vm15 = vweird.f32 %v545_v19 }
 0x6f6   :  { %v558_v29 = vor.u32 1.1754944e-38, %v557_v24  ;;  %vm556_vm2 = vcmp.eq.f32.partialorder %v555_v26, 8.507059e+37  ;;  %v723_v24 = vstv %s2613_s28  ;;  %v2196_v26 = vld [vmem:[%s3024_s4 + $0x48] sm:$0xff] }
 0x6fa   :  { %v2282_v20 = vpop.eup %2281 }
 0x6fb   :  { %v547_v21 = vmul.f32 %v2282_v20, %v545_v19  ;;  %vm552_vm14 = vweird.f32 %v2282_v20 }
 0x6fc   :  { %vm553_vm1 = vmor %vm551_vm15, %vm552_vm14 }
 0x6fd   :  { %v548_v23 = vsub.f32 1.0, %v547_v21 }
 0x6ff   :  { %v549_v25 = vmul.f32 %v2282_v20, %v548_v23  ;;  %v2198_v23 = vld [vmem:[%s3024_s4 + $0x58] sm:$0xff] }
 0x700   :  { %810 = vmatpush.bf16.msra.mxu3 %v2198_v23 }
 0x701   :  { %v550_v28 = vadd.f32 %v2282_v20, %v549_v25  ;;  %v724_v25 = vmul.f32 %v723_v24, %v2445_v55  ;;  %v898_v24 = vpop.permute.xlu1 %897 }
 0x703   :  { %v554_v31 = vsel %vm553_vm1, %v2282_v20, %v550_v28  ;;  %v725_v28 = vperm.slane %v724_v25, 0 }
 0x704   :  { %v559_v32 = vsel %vm556_vm2, %v558_v29, %v554_v31 }
 0x705   :  { %v561_v33 = vmul.f32 %v559_v32, %v541_v30  ;;  %v2195_v30 = vld [vmem:[%s3024_s4 + $0x40] sm:$0xff] }
 0x707   :  { %v570_v34 = vpack.c.bf16 %v561_v33, %v561_v33 }
 0x709   :  { %1925 = vmatmul.msk.bf16.vlgmr.msra.gmra.mxu1 %vm269_vm0, %v570_v34 }
 0x786   :  { %v607_v38 = vpop.f32.mrf.mxu1 }
 0x787   :  { %v608_v39 = vadd.f32 %v2477_v22, %v607_v38 }
 0x789   :  { %v1926_v40 = vmul.f32 -1.442695, %v608_v39  ;;  %v611_v60 = vmul.f32 0.909, %v608_v39 }
 0x78b   :  { %2283 = vpow2.f32 %v1926_v40 }
 0x78e   :  { %v609_v42 = vpop.f32.mrf.mxu1 }
 0x791   :  { %v2284_v45 = vpop.eup %2283 }
 0x792   :  { %v615_v46 = vadd.f32 1.0, %v2284_v45 }
 0x794   :  { %2285 = vrcp.f32 %v615_v46  ;;  %v627_v53 = vand.u32 2147483648, %v615_v46  ;;  %v625_v56 = vand.u32 2147483647, %v615_v46  ;;  %vm621_vm4 = vweird.f32 %v615_v46 }
 0x796   :  { %v628_v58 = vor.u32 1.1754944e-38, %v627_v53  ;;  %vm626_vm6 = vcmp.eq.f32.partialorder %v625_v56, 8.507059e+37  ;;  %v2202_v53 = vld [vmem:[%s3024_s4 + $0x78] sm:$0xff]  ;;  %v2200_v56 = vld [vmem:[%s3024_s4 + $0x68] sm:$0xff] }
 0x797   :  { %880 = vmatpush.bf16.msrb.mxu1 %v2202_v53 }
 0x79a   :  { %v2286_v47 = vpop.eup %2285 }
 0x79b   :  { %v617_v48 = vmul.f32 %v2286_v47, %v615_v46  ;;  %vm622_vm3 = vweird.f32 %v2286_v47 }
 0x79c   :  { %vm623_vm5 = vmor %vm621_vm4, %vm622_vm3 }
 0x79d   :  { %v618_v50 = vsub.f32 1.0, %v617_v48 }
 0x79f   :  { %v619_v54 = vmul.f32 %v2286_v47, %v618_v50 }
 0x7a1   :  { %v620_v57 = vadd.f32 %v2286_v47, %v619_v54  ;;  %v2201_v54 = vld [vmem:[%s3024_s4 + $0x70] sm:$0xff] }
 0x7a2   :  { %881 = vmatpush.bf16.msrb.mxu1 %v2201_v54 }
 0x7a3   :  { %v624_v49 = vsel %vm623_vm5, %v2286_v47, %v620_v57  ;;  %v2199_v57 = vld [vmem:[%s3024_s4 + $0x60] sm:$0xff] }
 0x7a4   :  { %v629_v62 = vsel %vm626_vm6, %v628_v58, %v624_v49 }
 0x7a5   :  { %v631_v0 = vmul.f32 %v629_v62, %v611_v60  ;;  %v1990_v62 = vld [vmem:[%s3021_s1 + $0x18] sm:$0xff] }
 0x7a6   :  { %882 = vmatpush.bf16.msrb.mxu1 %v2200_v56 }
 0x7a7   :  { %v640_v1 = vpack.c.bf16 %v631_v0, %v631_v0 }
 0x7a9   :  { %1943 = vmatmul.msk.bf16.vlgmr.msra.gmra.mxu2 %vm269_vm0, %v640_v1  ;;  %v1103_v1 = vmul.f32 0.5, %v1990_v62 }
 0x7aa   :  { %883 = vmatpush.bf16.msrb.mxu1 %v2199_v57 }
 0x82c   :  { %v677_v2 = vpop.f32.mrf.mxu2 }
 0x82d   :  { %v678_v3 = vadd.f32 %v2494_v44, %v677_v2 }
 0x82f   :  { %2287 = vtanh.f32 %v678_v3 }
 0x834   :  { %v679_v5 = vpop.f32.mrf.mxu2 }
 0x835   :  { %v2597_v51 = vpop.eup %2287 }
 0x836   :  { %v714_v8 = vmul.f32 %v2597_v51, %v712_v4  ;;  %v682_v9 = vadd.f32 %v2597_v51, %v2533_v52 }
 0x838   :  { %v692_v59 = vmul.f32 %v690_v7, %v682_v9  ;;  %716 = vrot.lane.b32.xlu0 %v714_v8, %s2359_s22  ;;  %v685_v12 = vmul.f32 %v684_v11, %v682_v9 }
 0x83a   :  { %694 = vrot.lane.b32.xlu2 %v692_v59, %s2359_s22  ;;  %v686_v13 = vadd.f32 %v685_v12, %v2548_v63  ;;  %v708_v63 = vmul.f32 %v2597_v51, %v707_v16 }
 0x842   :  { %919 = vrot.lane.b32.xlu2 %v1990_v62, %s2358_s18 }
 0x84a   :  { %1105 = vrot.lane.b32.xlu2 %v1103_v1, %s2358_s18 }
 0x894   :  { %v695_v14 = vpop.permute.xlu2 %694 }
 0x895   :  { %v2609_v15 = vadd.f32 %v695_v14, %v686_v13 }
 0x897   :  { %699 = vst.msk [vmem:[#allocation2 + $0x10] sm:$0xff] %vm181_vm11, %v2609_v15  ;;  %v705_v52 = vmul.f32 2.0, %v2609_v15 }
 0x899   :  { %v706_v17 = vsub.f32 %v705_v52, %v2556_v6  ;;  %v2197_v6 = vld [vmem:[%s3024_s4 + $0x50] sm:$0xff] }
 0x89a   :  { %811 = vmatpush.bf16.msra.mxu3 %v2197_v6 }
 0x89b   :  { %v709_v18 = vadd.f32 %v708_v63, %v706_v17  ;;  %v2203_v17 = vld [vmem:[%s3024_s4 + $0x30] sm:$0xff] }
 0x89c   :  { %950 = vmatpush.bf16.msrb.mxu2 %v2203_v17 }
 0x89e   :  { %812 = vmatpush.bf16.msra.mxu3 %v2196_v26 }
 0x8a2   :  { %813 = vmatpush.bf16.msra.mxu3 %v2195_v30 }
 0x8aa   :  { %v717_v19 = vpop.permute.xlu0 %716 }
 0x8ab   :  { %v2623_v20 = vadd.f32 %v717_v19, %v709_v18  ;;  %v920_v19 = vpop.permute.xlu2 %919 }
 0x8ad   :  { %v722_v21 = vpack.c.bf16 %v2623_v20, %v2623_v20 }
 0x8af   :  { %1951 = vmatmul.msk.bf16.vlgmr.msra.gmra.mxu0 %vm181_vm11, %v722_v21 }
 0x92c   :  { %v744_v29 = vpop.f32.mrf.mxu0 }
 0x92d   :  { %v745_v31 = vadd.f32 %v744_v29, %v725_v28  ;;  %v892_v28 = vstv %s891_s26  ;;  %s2742_s26 = sld [smem:[#allocation3 + $0x5]] }
 0x92f   :  { %v748_v32 = vadd.f32 %v2458_v61, %v745_v31 }
 0x931   :  { %v1952_v33 = vmul.f32 -1.442695, %v748_v32  ;;  %v749_v45 = vmul.f32 0.909, %v748_v32 }
 0x933   :  { %2289 = vpow2.f32 %v1952_v33  ;;  %s2746_s28 = ssub.f32 %s2742_s26, %s2675_s27 }
 0x934   :  { %v746_v34 = vpop.f32.mrf.mxu0  ;;  %s2838_s10 = ssub.f32 %s2834_s2, %s2742_s26 }
 0x935   :  { %s1307_s9 = smul.f32 0.5, %s2746_s28 }
 0x936   :  { %s1515_s16 = smul.f32 0.5, %s2838_s10 }
 0x939   :  { %v2290_v27 = vpop.eup %2289 }
 0x93a   :  { %v753_v35 = vadd.f32 1.0, %v2290_v27 }
 0x93c   :  { %2291 = vrcp.f32 %v753_v35  ;;  %v765_v39 = vand.u32 2147483648, %v753_v35  ;;  %v763_v41 = vand.u32 2147483647, %v753_v35  ;;  %vm759_vm8 = vweird.f32 %v753_v35 }
 0x93e   :  { %v766_v43 = vor.u32 1.1754944e-38, %v765_v39  ;;  %vm764_vm10 = vcmp.eq.f32.partialorder %v763_v41, 8.507059e+37  ;;  %v931_v39 = vstv %s2675_s27  ;;  %v2205_v41 = vld [vmem:[%s3024_s4 + $0x48] sm:$0xff] }
 0x942   :  { %v2292_v36 = vpop.eup %2291 }
 0x943   :  { %v755_v37 = vmul.f32 %v2292_v36, %v753_v35  ;;  %vm760_vm7 = vweird.f32 %v2292_v36 }
 0x944   :  { %vm761_vm9 = vmor %vm759_vm8, %vm760_vm7 }
 0x945   :  { %v756_v38 = vsub.f32 1.0, %v755_v37 }
 0x947   :  { %v757_v40 = vmul.f32 %v2292_v36, %v756_v38  ;;  %v2207_v38 = vld [vmem:[%s3024_s4 + $0x58] sm:$0xff] }
 0x948   :  { %1018 = vmatpush.bf16.msrb.mxu0 %v2207_v38 }
 0x949   :  { %v758_v42 = vadd.f32 %v2292_v36, %v757_v40  ;;  %v2206_v40 = vld [vmem:[%s3024_s4 + $0x50] sm:$0xff] }
 0x94b   :  { %v762_v46 = vsel %vm761_vm9, %v2292_v36, %v758_v42 }
 0x94c   :  { %v767_v47 = vsel %vm764_vm10, %v766_v43, %v762_v46  ;;  %1019 = vmatpush.bf16.msrb.mxu0 %v2206_v40 }
 0x94d   :  { %v769_v48 = vmul.f32 %v767_v47, %v749_v45  ;;  %v2204_v45 = vld [vmem:[%s3024_s4 + $0x40] sm:$0xff] }
 0x94f   :  { %v778_v50 = vpack.c.bf16 %v769_v48, %v769_v48 }
 0x950   :  { %1020 = vmatpush.bf16.msrb.mxu0 %v2205_v41 }
 0x951   :  { %1969 = vmatmul.msk.bf16.vlgmr.msra.gmra.mxu3 %vm269_vm0, %v778_v50 }
 0x954   :  { %1021 = vmatpush.bf16.msrb.mxu0 %v2204_v45 }
 0x9d4   :  { %v815_v58 = vpop.f32.mrf.mxu3 }
 0x9d5   :  { %v816_v60 = vadd.f32 %v2477_v22, %v815_v58 }
 0x9d7   :  { %v1970_v49 = vmul.f32 -1.442695, %v816_v60  ;;  %v819_v12 = vmul.f32 0.909, %v816_v60 }
 0x9d9   :  { %2293 = vpow2.f32 %v1970_v49 }
 0x9dc   :  { %v817_v0 = vpop.f32.mrf.mxu3 }
 0x9df   :  { %v2294_v2 = vpop.eup %2293 }
 0x9e0   :  { %v823_v3 = vadd.f32 1.0, %v2294_v2 }
 0x9e2   :  { %2295 = vrcp.f32 %v823_v3  ;;  %v835_v8 = vand.u32 2147483648, %v823_v3  ;;  %v833_v59 = vand.u32 2147483647, %v823_v3  ;;  %vm829_vm13 = vweird.f32 %v823_v3 }
 0x9e4   :  { %v836_v11 = vor.u32 1.1754944e-38, %v835_v8  ;;  %vm834_vm15 = vcmp.eq.f32.partialorder %v833_v59, 8.507059e+37  ;;  %v2209_v8 = vld [vmem:[%s3024_s4 + $0x68] sm:$0xff] }
 0x9e8   :  { %v2296_v4 = vpop.eup %2295 }
 0x9e9   :  { %v825_v5 = vmul.f32 %v2296_v4, %v823_v3  ;;  %vm830_vm12 = vweird.f32 %v2296_v4 }
 0x9ea   :  { %vm831_vm14 = vmor %vm829_vm13, %vm830_vm12 }
 0x9eb   :  { %v826_v7 = vsub.f32 1.0, %v825_v5  ;;  %v2211_v5 = vld [vmem:[%s3024_s4 + $0x78] sm:$0xff] }
 0x9ec   :  { %1088 = vmatpush.bf16.msrb.mxu3 %v2211_v5 }
 0x9ed   :  { %v827_v9 = vmul.f32 %v2296_v4, %v826_v7  ;;  %v2210_v7 = vld [vmem:[%s3024_s4 + $0x70] sm:$0xff] }
 0x9ef   :  { %v828_v10 = vadd.f32 %v2296_v4, %v827_v9  ;;  %v2208_v9 = vld [vmem:[%s3024_s4 + $0x60] sm:$0xff] }
 0x9f0   :  { %1089 = vmatpush.bf16.msrb.mxu3 %v2210_v7 }
 0x9f1   :  { %v832_v13 = vsel %vm831_vm14, %v2296_v4, %v828_v10 }
 0x9f2   :  { %v837_v14 = vsel %vm834_vm15, %v836_v11, %v832_v13 }
 0x9f3   :  { %v839_v52 = vmul.f32 %v837_v14, %v819_v12  ;;  %v2034_v12 = vld [vmem:[%s3021_s1 + $0x20] sm:$0xff] }
 0x9f4   :  { %1090 = vmatpush.bf16.msrb.mxu3 %v2209_v8  ;;  %v1311_v14 = vmul.f32 0.5, %v2034_v12 }
 0x9f5   :  { %v848_v16 = vpack.c.bf16 %v839_v52, %v839_v52 }
 0x9f7   :  { %1987 = vmatmul.msk.bf16.vlgmr.msrb.gmra.mxu1 %vm269_vm0, %v848_v16 }
 0x9f8   :  { %1091 = vmatpush.bf16.msrb.mxu3 %v2208_v9 }
 0xa74   :  { %v885_v63 = vpop.f32.mrf.mxu1 }
 0xa75   :  { %v886_v18 = vadd.f32 %v2494_v44, %v885_v63 }
 0xa77   :  { %2297 = vtanh.f32 %v886_v18 }
 0xa7c   :  { %v887_v21 = vpop.f32.mrf.mxu1 }
 0xa7d   :  { %v2667_v23 = vpop.eup %2297 }
 0xa7e   :  { %v922_v6 = vmul.f32 %v2667_v23, %v920_v19  ;;  %v890_v25 = vadd.f32 %v2667_v23, %v2597_v51  ;;  %v915_v51 = vstv %s2679_s29 }
 0xa7f   :  { %v916_v34 = vmul.f32 %v2667_v23, %v915_v51 }
 0xa80   :  { %v900_v26 = vmul.f32 %v898_v24, %v890_v25  ;;  %924 = vrot.lane.b32.xlu1 %v922_v6, %s2359_s22  ;;  %v893_v29 = vmul.f32 %v892_v28, %v890_v25 }
 0xa82   :  { %902 = vrot.lane.b32.xlu0 %v900_v26, %s2359_s22  ;;  %v894_v30 = vadd.f32 %v893_v29, %v2609_v15 }
 0xa8a   :  { %1127 = vrot.lane.b32.xlu0 %v2034_v12, %s2358_s18 }
 0xa92   :  { %1313 = vrot.lane.b32.xlu0 %v1311_v14, %s2358_s18 }
 0xaf2   :  { %v925_v36 = vpop.permute.xlu1 %924 }
 0xaf4   :  { %v903_v31 = vpop.permute.xlu0 %902 }
 0xaf5   :  { %v2682_v32 = vadd.f32 %v903_v31, %v894_v30 }
 0xaf7   :  { %907 = vst.msk [vmem:[#allocation2 + $0x18] sm:$0xff] %vm181_vm11, %v2682_v32  ;;  %v913_v33 = vmul.f32 2.0, %v2682_v32 }
 0xaf9   :  { %v914_v27 = vsub.f32 %v913_v33, %v2623_v20  ;;  %v932_v20 = vmul.f32 %v931_v39, %v2445_v55  ;;  %v1100_v39 = vstv %s1099_s25 }
 0xafb   :  { %v917_v35 = vadd.f32 %v916_v34, %v914_v27  ;;  %v933_v42 = vperm.slane %v932_v20, 0 }
 0xafc   :  { %v1128_v33 = vpop.permute.xlu0 %1127 }
 0xafd   :  { %v2690_v37 = vadd.f32 %v925_v36, %v917_v35  ;;  %v1106_v35 = vpop.permute.xlu2 %1105 }
 0xaff   :  { %v930_v15 = vpack.c.bf16 %v2690_v37, %v2690_v37 }
 0xb01   :  { %1995 = vmatmul.msk.bf16.vlgmr.msrb.gmra.mxu2 %vm181_vm11, %v930_v15 }
 0xb84   :  { %v952_v43 = vpop.f32.mrf.mxu2 }
 0xb85   :  { %v953_v46 = vadd.f32 %v952_v43, %v933_v42  ;;  %v1123_v42 = vstv %s2746_s28 }
 0xb87   :  { %v956_v47 = vadd.f32 %v2458_v61, %v953_v46 }
 0xb89   :  { %v1996_v48 = vmul.f32 -1.442695, %v956_v47  ;;  %v957_v1 = vmul.f32 0.909, %v956_v47 }
 0xb8b   :  { %2299 = vpow2.f32 %v1996_v48 }
 0xb8c   :  { %v954_v50 = vpop.f32.mrf.mxu2 }
 0xb91   :  { %v2300_v55 = vpop.eup %2299 }
 0xb92   :  { %v961_v53 = vadd.f32 1.0, %v2300_v55  ;;  %v2216_v55 = vld [vmem:[%s3024_s4 + $0x58] sm:$0xff] }
 0xb93   :  { %1226 = vmatpush.bf16.msra.mxu2 %v2216_v55  ;;  %v1314_v55 = vpop.permute.xlu0 %1313 }
 0xb94   :  { %2301 = vrcp.f32 %v961_v53  ;;  %v973_v58 = vand.u32 2147483648, %v961_v53  ;;  %v971_v49 = vand.u32 2147483647, %v961_v53  ;;  %vm967_vm2 = vweird.f32 %v961_v53 }
 0xb96   :  { %v974_v0 = vor.u32 1.1754944e-38, %v973_v58  ;;  %vm972_vm4 = vcmp.eq.f32.partialorder %v971_v49, 8.507059e+37  ;;  %v2213_v49 = vld [vmem:[%s3024_s4 + $0x40] sm:$0xff] }
 0xb9a   :  { %v2302_v54 = vpop.eup %2301 }
 0xb9b   :  { %v963_v56 = vmul.f32 %v2302_v54, %v961_v53  ;;  %vm968_vm1 = vweird.f32 %v2302_v54  ;;  %v1139_v53 = vstv %s2742_s26 }
 0xb9c   :  { %vm969_vm3 = vmor %vm967_vm2, %vm968_vm1 }
 0xb9d   :  { %v964_v57 = vsub.f32 1.0, %v963_v56 }
 0xb9f   :  { %v965_v60 = vmul.f32 %v2302_v54, %v964_v57  ;;  %v2214_v57 = vld [vmem:[%s3024_s4 + $0x48] sm:$0xff] }
 0xba1   :  { %v966_v62 = vadd.f32 %v2302_v54, %v965_v60 }
 0xba3   :  { %v970_v2 = vsel %vm969_vm3, %v2302_v54, %v966_v62  ;;  %v2215_v54 = vld [vmem:[%s3024_s4 + $0x50] sm:$0xff] }
 0xba4   :  { %v975_v61 = vsel %vm972_vm4, %v974_v0, %v970_v2  ;;  %1227 = vmatpush.bf16.msra.mxu2 %v2215_v54  ;;  %v2784_v0 = vld [vmem:[%s3025_s5 + $0x4] ss:$0 sm:$0xff] }
 0xba5   :  { %v977_v3 = vmul.f32 %v975_v61, %v957_v1 }
 0xba7   :  { %v986_v4 = vpack.c.bf16 %v977_v3, %v977_v3 }
 0xba8   :  { %1228 = vmatpush.bf16.msra.mxu2 %v2214_v57  ;;  %v2221_v57 = vld [vmem:[%s3024_s4 + $0x30] sm:$0xff] }
 0xba9   :  { %2013 = vmatmul.msk.bf16.vlgmr.msrb.gmra.mxu0 %vm269_vm0, %v986_v4  ;;  %1366 = vmatpush.bf16.msra.mxu3 %v2221_v57 }
 0xbac   :  { %1229 = vmatpush.bf16.msra.mxu2 %v2213_v49 }
 0xc26   :  { %v1023_v59 = vpop.f32.mrf.mxu0 }
 0xc27   :  { %v1024_v10 = vadd.f32 %v2477_v22, %v1023_v59 }
 0xc29   :  { %v2014_v11 = vmul.f32 -1.442695, %v1024_v10  ;;  %v1027_v25 = vmul.f32 0.909, %v1024_v10 }
 0xc2b   :  { %2303 = vpow2.f32 %v2014_v11 }
 0xc2e   :  { %v1025_v13 = vpop.f32.mrf.mxu0 }
 0xc31   :  { %v2304_v52 = vpop.eup %2303 }
 0xc32   :  { %v1031_v16 = vadd.f32 1.0, %v2304_v52 }
 0xc34   :  { %2305 = vrcp.f32 %v1031_v16  ;;  %v1043_v19 = vand.u32 2147483648, %v1031_v16  ;;  %v1041_v21 = vand.u32 2147483647, %v1031_v16  ;;  %vm1037_vm6 = vweird.f32 %v1031_v16 }
 0xc36   :  { %v1044_v6 = vor.u32 1.1754944e-38, %v1043_v19  ;;  %vm1042_vm8 = vcmp.eq.f32.partialorder %v1041_v21, 8.507059e+37  ;;  %v2218_v19 = vld [vmem:[%s3024_s4 + $0x68] sm:$0xff] }
 0xc3a   :  { %v2306_v17 = vpop.eup %2305 }
 0xc3b   :  { %v1033_v63 = vmul.f32 %v2306_v17, %v1031_v16  ;;  %vm1038_vm5 = vweird.f32 %v2306_v17 }
 0xc3c   :  { %vm1039_vm7 = vmor %vm1037_vm6, %vm1038_vm5 }
 0xc3d   :  { %v1034_v18 = vsub.f32 1.0, %v1033_v63  ;;  %v2220_v63 = vld [vmem:[%s3024_s4 + $0x78] sm:$0xff] }
 0xc3e   :  { %1296 = vmatpush.bf16.msra.mxu0 %v2220_v63 }
 0xc3f   :  { %v1035_v22 = vmul.f32 %v2306_v17, %v1034_v18  ;;  %v2219_v18 = vld [vmem:[%s3024_s4 + $0x70] sm:$0xff] }
 0xc41   :  { %v1036_v24 = vadd.f32 %v2306_v17, %v1035_v22  ;;  %v2217_v22 = vld [vmem:[%s3024_s4 + $0x60] sm:$0xff] }
 0xc42   :  { %1297 = vmatpush.bf16.msra.mxu0 %v2219_v18 }
 0xc43   :  { %v1040_v26 = vsel %vm1039_vm7, %v2306_v17, %v1036_v24  ;;  %v2803_v24 = vld [vmem:[%s3025_s5 + $0x5] ss:$0 sm:$0xff] }
 0xc44   :  { %v1045_v28 = vsel %vm1042_vm8, %v1044_v6, %v1040_v26  ;;  %v2078_v26 = vld [vmem:[%s3021_s1 + $0x28] sm:$0xff] }
 0xc45   :  { %v1047_v29 = vmul.f32 %v1045_v28, %v1027_v25 }
 0xc46   :  { %1298 = vmatpush.bf16.msra.mxu0 %v2218_v19 }
 0xc47   :  { %v1056_v30 = vpack.c.bf16 %v1047_v29, %v1047_v29  ;;  %v1519_v29 = vmul.f32 0.5, %v2078_v26 }
 0xc49   :  { %2031 = vmatmul.msk.bf16.vlgmr.msrb.gmra.mxu3 %vm269_vm0, %v1056_v30 }
 0xc4a   :  { %1299 = vmatpush.bf16.msra.mxu0 %v2217_v22 }
 0xccc   :  { %v1093_v31 = vpop.f32.mrf.mxu3 }
 0xccd   :  { %v1094_v51 = vadd.f32 %v2494_v44, %v1093_v31  ;;  %v2212_v44 = vld [vmem:[%s3024_s4 + $0x30] sm:$0xff] }
 0xcce   :  { %1158 = vmatpush.bf16.msra.mxu1 %v2212_v44 }
 0xccf   :  { %2307 = vtanh.f32 %v1094_v51 }
 0xcd4   :  { %v1095_v34 = vpop.f32.mrf.mxu3 }
 0xcd5   :  { %v2731_v27 = vpop.eup %2307 }
 0xcd6   :  { %v1130_v36 = vmul.f32 %v2731_v27, %v1128_v33  ;;  %v1098_v15 = vadd.f32 %v2731_v27, %v2667_v23  ;;  %v1124_v45 = vmul.f32 %v2731_v27, %v1123_v42 }
 0xcd8   :  { %v1108_v38 = vmul.f32 %v1106_v35, %v1098_v15  ;;  %1132 = vrot.lane.b32.xlu2 %v1130_v36, %s2359_s22  ;;  %v1101_v40 = vmul.f32 %v1100_v39, %v1098_v15 }
 0xcda   :  { %1110 = vrot.lane.b32.xlu1 %v1108_v38, %s2359_s22  ;;  %v1102_v23 = vadd.f32 %v1101_v40, %v2682_v32 }
 0xce2   :  { %1335 = vrot.lane.b32.xlu1 %v2078_v26, %s2358_s18 }
 0xcea   :  { %1521 = vrot.lane.b32.xlu1 %v1519_v29, %s2358_s18 }
 0xd32   :  { %v1133_v48 = vpop.permute.xlu2 %1132 }
 0xd4c   :  { %v1111_v20 = vpop.permute.xlu1 %1110 }
 0xd4d   :  { %v2749_v41 = vadd.f32 %v1111_v20, %v1102_v23 }
 0xd4f   :  { %1115 = vst.msk [vmem:[#allocation2 + $0x20] sm:$0xff] %vm181_vm11, %v2749_v41  ;;  %v1121_v43 = vmul.f32 2.0, %v2749_v41 }
 0xd51   :  { %v1122_v46 = vsub.f32 %v1121_v43, %v2690_v37  ;;  %v2772_v37 = vld [vmem:[%s3025_s5 + $0x3] sm:$0x1] }
 0xd52   :  { %v1140_v56 = vmul.f32 %v2772_v37, %v1139_v53 }
 0xd53   :  { %v1125_v47 = vadd.f32 %v1124_v45, %v1122_v46  ;;  %v2815_v45 = vld [vmem:[%s3025_s5 + $0x6] ss:$0 sm:$0xff] }
 0xd54   :  { %v1141_v58 = vperm.slane %v1140_v56, 0 }
 0xd55   :  { %v2757_v50 = vadd.f32 %v1133_v48, %v1125_v47  ;;  %v1336_v47 = vpop.permute.xlu1 %1335 }
 0xd57   :  { %v1138_v32 = vpack.c.bf16 %v2757_v50, %v2757_v50 }
 0xd59   :  { %2039 = vmatmul.msk.bf16.vlgmr.msra.gmra.mxu1 %vm181_vm11, %v1138_v32 }
 0xdd6   :  { %v1160_v60 = vpop.f32.mrf.mxu1 }
 0xdd7   :  { %v1161_v62 = vadd.f32 %v1160_v60, %v1141_v58  ;;  %v1308_v58 = vstv %s1307_s9 }
 0xdd9   :  { %v1164_v1 = vadd.f32 %v2784_v0, %v1161_v62 }
 0xddb   :  { %v2040_v2 = vmul.f32 -1.442695, %v1164_v1  ;;  %v1165_v13 = vmul.f32 0.909, %v1164_v1 }
 0xddd   :  { %2309 = vpow2.f32 %v2040_v2  ;;  %v1331_v2 = vstv %s2838_s10 }
 0xdde   :  { %v1162_v61 = vpop.f32.mrf.mxu1 }
 0xde3   :  { %v2310_v3 = vpop.eup %2309 }
 0xde4   :  { %v1169_v4 = vadd.f32 1.0, %v2310_v3 }
 0xde6   :  { %2311 = vrcp.f32 %v1169_v4  ;;  %v1181_v9 = vand.u32 2147483648, %v1169_v4  ;;  %v1179_v10 = vand.u32 2147483647, %v1169_v4  ;;  %vm1175_vm10 = vweird.f32 %v1169_v4 }
 0xde8   :  { %v1182_v12 = vor.u32 1.1754944e-38, %v1181_v9  ;;  %vm1180_vm13 = vcmp.eq.f32.partialorder %v1179_v10, 8.507059e+37  ;;  %v1347_v9 = vstv %s2834_s2  ;;  %v2223_v10 = vld [vmem:[%s3024_s4 + $0x48] sm:$0xff] }
 0xdec   :  { %v2312_v5 = vpop.eup %2311 }
 0xded   :  { %v1171_v7 = vmul.f32 %v2312_v5, %v1169_v4  ;;  %vm1176_vm9 = vweird.f32 %v2312_v5 }
 0xdee   :  { %vm1177_vm12 = vmor %vm1175_vm10, %vm1176_vm9 }
 0xdef   :  { %v1172_v8 = vsub.f32 1.0, %v1171_v7 }
 0xdf1   :  { %v1173_v59 = vmul.f32 %v2312_v5, %v1172_v8  ;;  %v2225_v8 = vld [vmem:[%s3024_s4 + $0x58] sm:$0xff] }
 0xdf2   :  { %1434 = vmatpush.bf16.msrb.mxu1 %v2225_v8 }
 0xdf3   :  { %v1174_v11 = vadd.f32 %v2312_v5, %v1173_v59  ;;  %v1348_v59 = vmul.f32 %v2772_v37, %v1347_v9 }
 0xdf5   :  { %v1178_v14 = vsel %vm1177_vm12, %v2312_v5, %v1174_v11  ;;  %v1349_v11 = vperm.slane %v1348_v59, 0  ;;  %vm1818_vm12 = vcmask 31744  }
 0xdf6   :  { %v1183_v52 = vsel %vm1180_vm13, %v1182_v12, %v1178_v14 }
 0xdf7   :  { %v1185_v16 = vmul.f32 %v1183_v52, %v1165_v13  ;;  %v2222_v13 = vld [vmem:[%s3024_s4 + $0x40] sm:$0xff] }
 0xdf9   :  { %v1194_v17 = vpack.c.bf16 %v1185_v16, %v1185_v16 }
 0xdfb   :  { %2057 = vmatmul.msk.bf16.vlgmr.msra.gmra.mxu2 %vm269_vm0, %v1194_v17 }
 0xe7e   :  { %v1231_v21 = vpop.f32.mrf.mxu2 }
 0xe7f   :  { %v1232_v6 = vadd.f32 %v2803_v24, %v1231_v21 }
 0xe81   :  { %v2058_v25 = vmul.f32 -1.442695, %v1232_v6  ;;  %v1235_v39 = vmul.f32 0.909, %v1232_v6 }
 0xe83   :  { %2313 = vpow2.f32 %v2058_v25 }
 0xe86   :  { %v1233_v28 = vpop.f32.mrf.mxu2 }
 0xe89   :  { %v2314_v30 = vpop.eup %2313 }
 0xe8a   :  { %v1239_v31 = vadd.f32 1.0, %v2314_v30 }
 0xe8c   :  { %2315 = vrcp.f32 %v1239_v31  ;;  %v1251_v35 = vand.u32 2147483648, %v1239_v31  ;;  %v1249_v15 = vand.u32 2147483647, %v1239_v31  ;;  %vm1245_vm15 = vweird.f32 %v1239_v31 }
 0xe8e   :  { %v1252_v44 = vor.u32 1.1754944e-38, %v1251_v35  ;;  %vm1250_vm2 = vcmp.eq.f32.partialorder %v1249_v15, 8.507059e+37  ;;  %v2229_v35 = vld [vmem:[%s3024_s4 + $0x78] sm:$0xff]  ;;  %v2227_v15 = vld [vmem:[%s3024_s4 + $0x68] sm:$0xff] }
 0xe8f   :  { %1504 = vmatpush.bf16.msrb.mxu2 %v2229_v35 }
 0xe92   :  { %v2316_v51 = vpop.eup %2315 }
 0xe93   :  { %v1241_v33 = vmul.f32 %v2316_v51, %v1239_v31  ;;  %vm1246_vm14 = vweird.f32 %v2316_v51 }
 0xe94   :  { %vm1247_vm1 = vmor %vm1245_vm15, %vm1246_vm14 }
 0xe95   :  { %v1242_v34 = vsub.f32 1.0, %v1241_v33 }
 0xe97   :  { %v1243_v36 = vmul.f32 %v2316_v51, %v1242_v34 }
 0xe99   :  { %v1244_v38 = vadd.f32 %v2316_v51, %v1243_v36  ;;  %v2228_v36 = vld [vmem:[%s3024_s4 + $0x70] sm:$0xff] }
 0xe9a   :  { %1505 = vmatpush.bf16.msrb.mxu2 %v2228_v36 }
 0xe9b   :  { %v1248_v40 = vsel %vm1247_vm1, %v2316_v51, %v1244_v38  ;;  %v2226_v38 = vld [vmem:[%s3024_s4 + $0x60] sm:$0xff] }
 0xe9c   :  { %v1253_v23 = vsel %vm1250_vm2, %v1252_v44, %v1248_v40 }
 0xe9d   :  { %v1255_v20 = vmul.f32 %v1253_v23, %v1235_v39  ;;  %v2239_v23 = vld [vmem:[%s3024_s4 + $0x80] sm:$0xff] }
 0xe9e   :  { %1506 = vmatpush.bf16.msrb.mxu2 %v2227_v15 }
 0xe9f   :  { %v1264_v42 = vpack.c.bf16 %v1255_v20, %v1255_v20 }
 0xea1   :  { %2075 = vmatmul.msk.bf16.vlgmr.msra.gmra.mxu0 %vm269_vm0, %v1264_v42 }
 0xea2   :  { %1507 = vmatpush.bf16.msrb.mxu2 %v2226_v38  ;;  %v1740_v38 = vld [vmem:[#allocation2] sm:$0xff] }
 0xea6   :  { %2240 = vmatpush.bf16.msra.mxu2 %v2239_v23 }
 0xf1e   :  { %v1301_v43 = vpop.f32.mrf.mxu0 }
 0xf1f   :  { %v1302_v46 = vadd.f32 %v2815_v45, %v1301_v43 }
 0xf21   :  { %2317 = vtanh.f32 %v1302_v46  ;;  %v2122_v46 = vld [vmem:[%s3021_s1 + $0x30] sm:$0xff] }
 0xf26   :  { %v1303_v48 = vpop.f32.mrf.mxu0 }
 0xf27   :  { %v2818_v32 = vpop.eup %2317 }
 0xf28   :  { %v1338_v53 = vmul.f32 %v2818_v32, %v1336_v47  ;;  %v1306_v54 = vadd.f32 %v2818_v32, %v2731_v27 }
 0xf2a   :  { %v1316_v56 = vmul.f32 %v1314_v55, %v1306_v54  ;;  %1340 = vrot.lane.b32.xlu0 %v1338_v53, %s2359_s22  ;;  %v1309_v60 = vmul.f32 %v1308_v58, %v1306_v54  ;;  %v1727_v54 = vmul.f32 0.5, %v2122_v46 }
 0xf2c   :  { %1318 = vrot.lane.b32.xlu2 %v1316_v56, %s2359_s22  ;;  %v1310_v49 = vadd.f32 %v1309_v60, %v2749_v41  ;;  %v1332_v41 = vmul.f32 %v2818_v32, %v1331_v2 }
 0xf34   :  { %1543 = vrot.lane.b32.xlu2 %v2122_v46, %s2358_s18  ;;  %v2232_v46 = vld [vmem:[%s3024_s4 + $0x48] sm:$0xff] }
 0xf3c   :  { %1729 = vrot.lane.b32.xlu2 %v1727_v54, %s2358_s18 }
 0xf86   :  { %v1319_v62 = vpop.permute.xlu2 %1318 }
 0xf87   :  { %v2830_v1 = vadd.f32 %v1319_v62, %v1310_v49 }
 0xf89   :  { %1323 = vst.msk [vmem:[#allocation2 + $0x28] sm:$0xff] %vm181_vm11, %v2830_v1  ;;  %v1329_v27 = vmul.f32 2.0, %v2830_v1 }
 0xf8b   :  { %v1330_v61 = vsub.f32 %v1329_v27, %v2757_v50  ;;  %v2224_v50 = vld [vmem:[%s3024_s4 + $0x50] sm:$0xff] }
 0xf8c   :  { %1435 = vmatpush.bf16.msrb.mxu1 %v2224_v50 }
 0xf8d   :  { %v1333_v3 = vadd.f32 %v1332_v41, %v1330_v61 }
 0xf8e   :  { %v1544_v50 = vpop.permute.xlu2 %1543 }
 0xf90   :  { %1436 = vmatpush.bf16.msrb.mxu1 %v2223_v10  ;;  %v1745_v41 = vld [vmem:[#allocation2 + $0x28] sm:$0xff] }
 0xf94   :  { %1437 = vmatpush.bf16.msrb.mxu1 %v2222_v13 }
 0xf9c   :  { %v1341_v4 = vpop.permute.xlu0 %1340 }
 0xf9d   :  { %v2844_v5 = vadd.f32 %v1341_v4, %v1333_v3  ;;  %v1744_v3 = vld [vmem:[#allocation2 + $0x20] sm:$0xff] }
 0xf9e   :  { %v1752_v4 = vpack.c.bf16 %v1745_v41, %v1744_v3  ;;  %v1803_v41 = vld [vmem:[%s3023_s3 + $0x8] sm:$0xff] }
 0xf9f   :  { %v1346_v7 = vpack.c.bf16 %v2844_v5, %v2844_v5 }
 0xfa1   :  { %2083 = vmatmul.msk.bf16.vlgmr.msra.gmra.mxu3 %vm181_vm11, %v1346_v7  ;;  %v2230_v7 = vld [vmem:[%s3024_s4 + $0x30] sm:$0xff] }
 0xfa2   :  { %1574 = vmatpush.bf16.msrb.mxu0 %v2230_v7 }
 0xfa6   :  { %1780 = vmatpush.bf16.msra.mxu0 %v2239_v23 }
0x1024   :  { %v1368_v12 = vpop.f32.mrf.mxu3 }
0x1025   :  { %v1369_v14 = vadd.f32 %v1368_v12, %v1349_v11  ;;  %v1522_v11 = vpop.permute.xlu1 %1521 }
0x1027   :  { %v1372_v52 = vadd.f32 %v2784_v0, %v1369_v14 }
0x1029   :  { %v2084_v16 = vmul.f32 -1.442695, %v1372_v52  ;;  %v1373_v30 = vmul.f32 0.909, %v1372_v52  ;;  %v2901_v52 = vld [vmem:[%s3025_s5 + $0x7] ss:$0 sm:$0xff] }
0x102b   :  { %2319 = vpow2.f32 %v2084_v16 }
0x102c   :  { %v1370_v17 = vpop.f32.mrf.mxu3 }
0x102d   :  { %v1806_v17 = vld [vmem:[%s3023_s3 + $0x20] sm:$0xff] }
0x1031   :  { %v2320_v63 = vpop.eup %2319 }
0x1032   :  { %v1377_v18 = vadd.f32 1.0, %v2320_v63 }
0x1034   :  { %2321 = vrcp.f32 %v1377_v18  ;;  %v1389_v6 = vand.u32 2147483648, %v1377_v18  ;;  %v1387_v26 = vand.u32 2147483647, %v1377_v18  ;;  %vm1383_vm4 = vweird.f32 %v1377_v18 }
0x1036   :  { %v1390_v29 = vor.u32 1.1754944e-38, %v1389_v6  ;;  %vm1388_vm6 = vcmp.eq.f32.partialorder %v1387_v26, 8.507059e+37  ;;  %v1516_v6 = vstv %s1515_s16 }
0x103a   :  { %v2322_v19 = vpop.eup %2321 }
0x103b   :  { %v1379_v22 = vmul.f32 %v2322_v19, %v1377_v18  ;;  %vm1384_vm3 = vweird.f32 %v2322_v19 }
0x103c   :  { %vm1385_vm5 = vmor %vm1383_vm4, %vm1384_vm3 }
0x103d   :  { %v1380_v21 = vsub.f32 1.0, %v1379_v22 }
0x103f   :  { %v1381_v25 = vmul.f32 %v2322_v19, %v1380_v21 }
0x1041   :  { %v1382_v28 = vadd.f32 %v2322_v19, %v1381_v25 }
0x1043   :  { %v1386_v31 = vsel %vm1385_vm5, %v2322_v19, %v1382_v28  ;;  %v1807_v19 = vld [vmem:[%s3023_s3 + $0x28] sm:$0xff] }
0x1044   :  { %v1391_v51 = vsel %vm1388_vm6, %v1390_v29, %v1386_v31 }
0x1045   :  { %v1393_v33 = vmul.f32 %v1391_v51, %v1373_v30  ;;  %v1539_v30 = vstv %s2922_s20 }
0x1047   :  { %v1402_v34 = vpack.c.bf16 %v1393_v33, %v1393_v33 }
0x1049   :  { %2101 = vmatmul.msk.bf16.vlgmr.msrb.gmra.mxu1 %vm269_vm0, %v1402_v34 }
0x10c6   :  { %v1439_v44 = vpop.f32.mrf.mxu1 }
0x10c7   :  { %v1440_v39 = vadd.f32 %v2803_v24, %v1439_v44 }
0x10c9   :  { %v2102_v40 = vmul.f32 -1.442695, %v1440_v39  ;;  %v1443_v49 = vmul.f32 0.909, %v1440_v39  ;;  %v1743_v39 = vld [vmem:[#allocation2 + $0x18] sm:$0xff] }
0x10cb   :  { %2323 = vpow2.f32 %v2102_v40  ;;  %v1742_v40 = vld [vmem:[#allocation2 + $0x10] sm:$0xff] }
0x10cc   :  { %v1751_v23 = vpack.c.bf16 %v1743_v39, %v1742_v40 }
0x10ce   :  { %v1441_v20 = vpop.f32.mrf.mxu1 }
0x10cf   :  { %v1555_v20 = vstv %s2120_s17 }
0x10d1   :  { %v2324_v42 = vpop.eup %2323 }
0x10d2   :  { %v1447_v43 = vadd.f32 1.0, %v2324_v42  ;;  %v2233_v42 = vld [vmem:[%s3024_s4 + $0x50] sm:$0xff] }
0x10d4   :  { %2325 = vrcp.f32 %v1447_v43  ;;  %v1459_v53 = vand.u32 2147483648, %v1447_v43  ;;  %v1457_v57 = vand.u32 2147483647, %v1447_v43  ;;  %vm1453_vm8 = vweird.f32 %v1447_v43 }
0x10d6   :  { %v1460_v60 = vor.u32 1.1754944e-38, %v1459_v53  ;;  %vm1458_vm10 = vcmp.eq.f32.partialorder %v1457_v57, 8.507059e+37 }
0x10da   :  { %v2326_v47 = vpop.eup %2325 }
0x10db   :  { %v1449_v48 = vmul.f32 %v2326_v47, %v1447_v43  ;;  %vm1454_vm7 = vweird.f32 %v2326_v47  ;;  %v1556_v43 = vmul.f32 %v2772_v37, %v1555_v20 }
0x10dc   :  { %vm1455_vm9 = vmor %vm1453_vm8, %vm1454_vm7 }
0x10dd   :  { %v1450_v55 = vsub.f32 1.0, %v1449_v48 }
0x10df   :  { %v1451_v56 = vmul.f32 %v2326_v47, %v1450_v55  ;;  %v2231_v55 = vld [vmem:[%s3024_s4 + $0x40] sm:$0xff] }
0x10e1   :  { %v1452_v58 = vadd.f32 %v2326_v47, %v1451_v56 }
0x10e3   :  { %v1456_v62 = vsel %vm1455_vm9, %v2326_v47, %v1452_v58  ;;  %v1557_v47 = vperm.slane %v1556_v43, 0 }
0x10e4   :  { %v1461_v27 = vsel %vm1458_vm10, %v1460_v60, %v1456_v62 }
0x10e5   :  { %v1463_v2 = vmul.f32 %v1461_v27, %v1443_v49  ;;  %v1802_v49 = vld [vmem:[%s3023_s3] sm:$0xff] }
0x10e7   :  { %v1472_v61 = vpack.c.bf16 %v1463_v2, %v1463_v2 }
0x10e9   :  { %2119 = vmatmul.msk.bf16.vlgmr.msrb.gmra.mxu2 %vm269_vm0, %v1472_v61 }
0x10f9   :  { %2170 = vmatmul.msk.bf16.vlgmr.msra.gmra.mxu2 %vm181_vm11, %v1752_v4 }
0x116c   :  { %v1509_v8 = vpop.f32.mrf.mxu2 }
0x116d   :  { %v1510_v9 = vadd.f32 %v2815_v45, %v1509_v8 }
0x116f   :  { %2327 = vtanh.f32 %v1510_v9 }
0x1174   :  { %v1511_v59 = vpop.f32.mrf.mxu2 }
0x1175   :  { %v2892_v10 = vpop.eup %2327 }
0x1176   :  { %v1546_v12 = vmul.f32 %v2892_v10, %v1544_v50  ;;  %v1514_v13 = vadd.f32 %v2892_v10, %v2818_v32  ;;  %v1540_v51 = vmul.f32 %v2892_v10, %v1539_v30  ;;  %v2236_v30 = vld [vmem:[%s3024_s4 + $0x68] sm:$0xff] }
0x1178   :  { %v1524_v14 = vmul.f32 %v1522_v11, %v1514_v13  ;;  %1548 = vrot.lane.b32.xlu1 %v1546_v12, %s2359_s22  ;;  %v1517_v25 = vmul.f32 %v1516_v6, %v1514_v13 }
0x117a   :  { %1526 = vrot.lane.b32.xlu0 %v1524_v14, %s2359_s22  ;;  %v1518_v26 = vadd.f32 %v1517_v25, %v2830_v1  ;;  %v1741_v1 = vld [vmem:[#allocation2 + $0x8] sm:$0xff] }
0x117b   :  { %v1750_v44 = vpack.c.bf16 %v1741_v1, %v1740_v38 }
0x117c   :  { %v1792_v16 = vpop.f32.mrf.mxu2 }
0x117d   :  { %v1793_v63 = vadd.f32 %v2901_v52, %v1792_v16 }
0x117f   :  { %v1814_v32 = vadd.f32 %v1806_v17, %v1793_v63  ;;  %v1804_v17 = vld [vmem:[%s3023_s3 + $0x10] sm:$0xff] }
0x1181   :  { %1823 = vst.msk [vmem:[%s3026_s6 + $0x20] sm:$0xff] %vm1818_vm12, %v1814_v32 }
0x1184   :  { %v1794_v18 = vpop.f32.mrf.mxu2 }
0x1185   :  { %v1795_v22 = vadd.f32 %v2901_v52, %v1794_v18 }
0x1187   :  { %v1815_v21 = vadd.f32 %v1807_v19, %v1795_v22 }
0x1189   :  { %1824 = vst.msk [vmem:[%s3026_s6 + $0x28] sm:$0xff] %vm1818_vm12, %v1815_v21  ;;  %v1805_v21 = vld [vmem:[%s3023_s3 + $0x18] sm:$0xff] }
0x11ea   :  { %v1549_v35 = vpop.permute.xlu1 %1548 }
0x11ec   :  { %v1527_v28 = vpop.permute.xlu0 %1526 }
0x11ed   :  { %v2925_v29 = vadd.f32 %v1527_v28, %v1518_v26  ;;  %v2238_v26 = vld [vmem:[%s3024_s4 + $0x78] sm:$0xff]  ;;  %v2237_v28 = vld [vmem:[%s3024_s4 + $0x70] sm:$0xff] }
0x11ee   :  { %1712 = vmatpush.bf16.msra.mxu1 %v2238_v26 }
0x11ef   :  { %1531 = vst.msk [vmem:[#allocation2 + $0x30] sm:$0xff] %vm181_vm11, %v2925_v29  ;;  %v1537_v31 = vmul.f32 2.0, %v2925_v29 }
0x11f1   :  { %v1538_v33 = vsub.f32 %v1537_v31, %v2844_v5  ;;  %v2234_v5 = vld [vmem:[%s3024_s4 + $0x58] sm:$0xff]  ;;  %v2235_v31 = vld [vmem:[%s3024_s4 + $0x60] sm:$0xff]  ;;  %s1723_s4 = smul.f32 0.5, %s2922_s20 }
0x11f2   :  { %1642 = vmatpush.bf16.msrb.mxu3 %v2234_v5  ;;  %1713 = vmatpush.bf16.msra.mxu1 %v2237_v28 }
0x11f3   :  { %v1541_v34 = vadd.f32 %v1540_v51, %v1538_v33 }
0x11f5   :  { %v1551_v36 = vadd.f32 %v1549_v35, %v1541_v34 }
0x11f6   :  { %1643 = vmatpush.bf16.msrb.mxu3 %v2233_v42  ;;  %1714 = vmatpush.bf16.msra.mxu1 %v2236_v30 }
0x11f7   :  { %v1554_v15 = vpack.c.bf16 %v1551_v36, %v1551_v36 }
0x11f9   :  { %2127 = vmatmul.msk.bf16.vlgmr.msrb.gmra.mxu0 %vm181_vm11, %v1554_v15 }
0x11fa   :  { %1644 = vmatpush.bf16.msrb.mxu3 %v2232_v46  ;;  %1715 = vmatpush.bf16.msra.mxu1 %v2235_v31 }
0x11fe   :  { %1645 = vmatpush.bf16.msrb.mxu3 %v2231_v55 }
0x1209   :  { %2168 = vmatmul.msk.bf16.vlgmr.msra.gmra.mxu0 %vm181_vm11, %v1750_v44 }
0x1219   :  { %2169 = vmatmul.msk.bf16.gmra.mxu0 %vm181_vm11, %v1751_v23 }
0x1276   :  { %v1576_v48 = vpop.f32.mrf.mxu0 }
0x1277   :  { %v1577_v53 = vadd.f32 %v1576_v48, %v1557_v47 }
0x1279   :  { %v1580_v54 = vadd.f32 %v2784_v0, %v1577_v53 }
0x127b   :  { %v2128_v56 = vmul.f32 -1.442695, %v1580_v54  ;;  %v1581_v12 = vmul.f32 0.909, %v1580_v54 }
0x127d   :  { %2329 = vpow2.f32 %v2128_v56  ;;  %v1730_v56 = vpop.permute.xlu2 %1729 }
0x127e   :  { %v1578_v57 = vpop.f32.mrf.mxu0 }
0x1283   :  { %v2330_v37 = vpop.eup %2329 }
0x1284   :  { %v1585_v58 = vadd.f32 1.0, %v2330_v37 }
0x1286   :  { %2331 = vrcp.f32 %v1585_v58  ;;  %v1782_v60 = vpop.f32.mrf.mxu0  ;;  %v1597_v7 = vand.u32 2147483648, %v1585_v58  ;;  %v1595_v9 = vand.u32 2147483647, %v1585_v58  ;;  %vm1591_vm14 = vweird.f32 %v1585_v58 }
0x1287   :  { %v1783_v62 = vadd.f32 %v2901_v52, %v1782_v60 }
0x1288   :  { %v1598_v11 = vor.u32 1.1754944e-38, %v1597_v7  ;;  %vm1596_vm1 = vcmp.eq.f32.partialorder %v1595_v9, 8.507059e+37 }
0x1289   :  { %v1810_v27 = vadd.f32 %v1802_v49, %v1783_v62 }
0x128b   :  { %1819 = vst.msk [vmem:[%s3026_s6] sm:$0xff] %vm1818_vm12, %v1810_v27 }
0x128c   :  { %v2332_v0 = vpop.eup %2331 }
0x128d   :  { %v1587_v2 = vmul.f32 %v2332_v0, %v1585_v58  ;;  %vm1592_vm13 = vweird.f32 %v2332_v0  ;;  %v1724_v58 = vstv %s1723_s4 }
0x128e   :  { %v1784_v61 = vpop.f32.mrf.mxu0  ;;  %vm1593_vm15 = vmor %vm1591_vm14, %vm1592_vm13 }
0x128f   :  { %v1588_v3 = vsub.f32 1.0, %v1587_v2  ;;  %v1785_v4 = vadd.f32 %v2901_v52, %v1784_v61 }
0x1291   :  { %v1589_v8 = vmul.f32 %v2332_v0, %v1588_v3  ;;  %v1811_v50 = vadd.f32 %v1803_v41, %v1785_v4  ;;  %v1809_v4 = vld [vmem:[%s3023_s3 + $0x38] sm:$0xff] }
0x1293   :  { %v1590_v59 = vadd.f32 %v2332_v0, %v1589_v8  ;;  %1820 = vst.msk [vmem:[%s3026_s6 + $0x8] sm:$0xff] %vm1818_vm12, %v1811_v50 }
0x1295   :  { %v1594_v13 = vsel %vm1593_vm15, %v2332_v0, %v1590_v59  ;;  %v1746_v0 = vld [vmem:[#allocation2 + $0x30] sm:$0xff] }
0x1296   :  { %v1599_v14 = vsel %vm1596_vm1, %v1598_v11, %v1594_v13  ;;  %v1787_v16 = vpop.f32.mrf.mxu0 }
0x1297   :  { %v1601_v63 = vmul.f32 %v1599_v14, %v1581_v12  ;;  %v1788_v32 = vadd.f32 %v2901_v52, %v1787_v16 }
0x1299   :  { %v1610_v18 = vpack.c.bf16 %v1601_v63, %v1601_v63  ;;  %v1812_v19 = vadd.f32 %v1804_v17, %v1788_v32 }
0x129b   :  { %1821 = vst.msk [vmem:[%s3026_s6 + $0x10] sm:$0xff] %vm1818_vm12, %v1812_v19  ;;  %2145 = vmatmul.msk.bf16.vlgmr.msrb.gmra.mxu3 %vm269_vm0, %v1610_v18 }
0x129e   :  { %v1789_v22 = vpop.f32.mrf.mxu0 }
0x129f   :  { %v1790_v6 = vadd.f32 %v2901_v52, %v1789_v22 }
0x12a1   :  { %v1813_v25 = vadd.f32 %v1805_v21, %v1790_v6 }
0x12a3   :  { %1822 = vst.msk [vmem:[%s3026_s6 + $0x18] sm:$0xff] %vm1818_vm12, %v1813_v25 }
0x131e   :  { %v1647_v51 = vpop.f32.mrf.mxu3 }
0x131f   :  { %v1648_v33 = vadd.f32 %v2803_v24, %v1647_v51 }
0x1321   :  { %v2146_v34 = vmul.f32 -1.442695, %v1648_v33  ;;  %v1651_v42 = vmul.f32 0.909, %v1648_v33 }
0x1323   :  { %2333 = vpow2.f32 %v2146_v34 }
0x1326   :  { %v1649_v35 = vpop.f32.mrf.mxu3 }
0x1329   :  { %v2334_v36 = vpop.eup %2333 }
0x132a   :  { %v1655_v15 = vadd.f32 1.0, %v2334_v36 }
0x132c   :  { %2335 = vrcp.f32 %v1655_v15  ;;  %v1667_v39 = vand.u32 2147483648, %v1655_v15  ;;  %v1665_v23 = vand.u32 2147483647, %v1655_v15  ;;  %vm1661_vm3 = vweird.f32 %v1655_v15 }
0x132e   :  { %v1668_v20 = vor.u32 1.1754944e-38, %v1667_v39  ;;  %vm1666_vm5 = vcmp.eq.f32.partialorder %v1665_v23, 8.507059e+37 }
0x1332   :  { %v2336_v1 = vpop.eup %2335 }
0x1333   :  { %v1657_v38 = vmul.f32 %v2336_v1, %v1655_v15  ;;  %vm1662_vm2 = vweird.f32 %v2336_v1 }
0x1334   :  { %vm1663_vm4 = vmor %vm1661_vm3, %vm1662_vm2 }
0x1335   :  { %v1658_v44 = vsub.f32 1.0, %v1657_v38 }
0x1337   :  { %v1659_v40 = vmul.f32 %v2336_v1, %v1658_v44 }
0x1339   :  { %v1660_v5 = vadd.f32 %v2336_v1, %v1659_v40 }
0x133b   :  { %v1664_v24 = vsel %vm1663_vm4, %v2336_v1, %v1660_v5 }
0x133c   :  { %v1669_v43 = vsel %vm1666_vm5, %v1668_v20, %v1664_v24 }
0x133d   :  { %v1671_v46 = vmul.f32 %v1669_v43, %v1651_v42 }
0x133f   :  { %v1680_v47 = vpack.c.bf16 %v1671_v46, %v1671_v46 }
0x1341   :  { %2163 = vmatmul.msk.bf16.vlgmr.msra.gmra.mxu1 %vm269_vm0, %v1680_v47 }
0x13be   :  { %v1717_v48 = vpop.f32.mrf.mxu1 }
0x13bf   :  { %v1718_v55 = vadd.f32 %v2815_v45, %v1717_v48 }
0x13c1   :  { %2337 = vtanh.f32 %v1718_v55 }
0x13c6   :  { %v1719_v53 = vpop.f32.mrf.mxu1 }
0x13c7   :  { %v2338_v54 = vpop.eup %2337 }
0x13c8   :  { %v1722_v57 = vadd.f32 %v2338_v54, %v2892_v10  ;;  %v1808_v10 = vld [vmem:[%s3023_s3 + $0x30] sm:$0xff] }
0x13ca   :  { %v1732_v37 = vmul.f32 %v1730_v56, %v1722_v57  ;;  %v1725_v60 = vmul.f32 %v1724_v58, %v1722_v57 }
0x13cc   :  { %1734 = vrot.lane.b32.xlu0 %v1732_v37, %s2359_s22  ;;  %v1726_v49 = vadd.f32 %v1725_v60, %v2925_v29 }
0x143e   :  { %v1735_v62 = vpop.permute.xlu0 %1734 }
0x143f   :  { %v1737_v27 = vadd.f32 %v1735_v62, %v1726_v49 }
0x1441   :  { %1739 = vst.msk [vmem:[#allocation2 + $0x38] sm:$0xff] %vm181_vm11, %v1737_v27 }
0x1448   :  { %v1747_v45 = vld [vmem:[#allocation2 + $0x38] sm:$0xff] }
0x1449   :  { %v1753_v2 = vpack.c.bf16 %v1747_v45, %v1746_v0 }
0x144b   :  { %2171 = vmatmul.msk.bf16.gmra.mxu2 %vm181_vm11, %v1753_v2 }
0x14ce   :  { %v1797_v61 = vpop.f32.mrf.mxu2 }
0x14cf   :  { %v1798_v41 = vadd.f32 %v2901_v52, %v1797_v61 }
0x14d1   :  { %v1816_v3 = vadd.f32 %v1808_v10, %v1798_v41 }
0x14d3   :  { %1825 = vst.msk [vmem:[%s3026_s6 + $0x30] sm:$0xff] %vm1818_vm12, %v1816_v3 }
0x14d6   :  { %v1799_v29 = vpop.f32.mrf.mxu2 }
0x14d7   :  { %v1800_v7 = vadd.f32 %v2901_v52, %v1799_v29 }
0x14d9   :  { %v1817_v8 = vadd.f32 %v1809_v4, %v1800_v7 }
0x14db   :  { %1826 = vst.msk [vmem:[%s3026_s6 + $0x38] sm:$0xff] %vm1818_vm12, %v1817_v8 }
0x14dc   :  { %1831 = vsyncpa [#allocation4], 1 }

</bundles_post_ra>
